<compile_context>
chip_gen: v6e
topology: v6e:2x2x1
jax: 0.10.0
libtpu: 0.0.40
codegen_flags: <defaults>
</compile_context>

<pallas_src>
import functools
import math

import jax
import jax.numpy as jnp
from jax.experimental import pallas as pl
from jax.experimental.pallas import tpu as pltpu


DENSE3_TAPS = tuple((kh, kw) for kh in range(3) for kw in range(3))   # 3x3 conv, pad=1
SSPCAB_TAPS = ((0, 0), (4, 0), (0, 4), (4, 4))                        # SSPCAB corners, pad=2


# ---------------------------------------------------------------------------
# Generation-aware VMEM plan
# ---------------------------------------------------------------------------
_PLAN_CACHE = {}


def _chip_plan():
    if 'plan' in _PLAN_CACHE:
        return _PLAN_CACHE['plan']
    vmem = 128 << 20
    try:
        vmem = int(getattr(pltpu.get_tpu_info(), 'vmem_capacity_bytes', vmem))
    except Exception:
        pass
    if vmem <= (96 << 20):
        # v7x-class: 64 MiB VMEM per TensorCore, 2 TCs per chip.
        limit = min(int(vmem * 0.85), 56 << 20)
        plan = dict(vmem_limit=limit, cap=int(limit * 0.85),
                    weight=6 << 20, mxu_k=256, min_parallel=2)
    else:
        # v5e / v6e: 128 MiB VMEM, 1 TC per chip.
        limit = 100 << 20
        plan = dict(vmem_limit=limit, cap=int(limit * 0.85),
                    weight=12 << 20, mxu_k=256, min_parallel=1)
    _PLAN_CACHE['plan'] = plan
    return plan


def _vmem_limit(est_bytes, plan):
    return int(min(max(32 << 20, int(est_bytes) + (8 << 20)), plan['vmem_limit']))


def _round_up(v, m):
    return ((v + m - 1) // m) * m


# ---------------------------------------------------------------------------
# Generic "tap conv" kernel:
#   out[i, j, :] = act( (sum_t x_zeropad[i + kh_t - pad, j + kw_t - pad, :] @ W[t])
#                       * scale + bias )
# grid = (N, H/TH, Cin/TC); Cin is a reduction ("arbitrary", innermost).
# Input is passed three times (center / top halo / bottom halo row blocks) so Pallas
# auto-pipelines the HBM traffic; the kernel assembles a zero-padded tile in VMEM.
# ---------------------------------------------------------------------------
def _tap_conv_kernel(xc_ref, xt_ref, xb_ref, w_ref, s_ref, b_ref, o_ref, *scratch,
                     taps, TH, W, pad, n_c, relu):
    if n_c > 1:
        xbuf, acc_ref = scratch
    else:
        (xbuf,) = scratch
        acc_ref = None

    h = pl.program_id(1)
    c = pl.program_id(2)
    n_h = pl.num_programs(1)
    TC = xc_ref.shape[-1]
    HP = TH + 2 * pad

    # ---- constant (zero) padding regions: once per (n, h) tile (c == 0); the
    #      side columns / boundary rows are never overwritten inside the c loop ----
    @pl.when(c == 0)
    def _init_pad():
        zcol = jnp.zeros((HP, pad, TC), xbuf.dtype)
        xbuf[:, 0:pad, :] = zcol
        xbuf[:, pad + W:, :] = zcol
        zrow = jnp.zeros((pad, W, TC), xbuf.dtype)

        @pl.when(h == 0)
        def _():
            xbuf[0:pad, pad:pad + W, :] = zrow

        @pl.when(h == n_h - 1)
        def _():
            xbuf[pad + TH:, pad:pad + W, :] = zrow

    # ---- halo rows (new channel slice every c step) ----
    @pl.when(h > 0)
    def _():
        xbuf[0:pad, pad:pad + W, :] = xt_ref[0]

    @pl.when(h < n_h - 1)
    def _():
        xbuf[pad + TH:, pad:pad + W, :] = xb_ref[0]

    # ---- center rows (auto-pipelined by Pallas across grid steps) ----
    xbuf[pad:pad + TH, pad:pad + W, :] = xc_ref[0]

    # ---- ntaps MXU matmuls on the flattened (TH*W, TC) slab.  Taps sharing a kw
    #      reuse one shifted view so the misaligned-window relayout happens once per
    #      distinct kw, not once per tap. ----
    part = None
    for kw in sorted({kw_ for _, kw_ in taps}):
        col = xbuf[:, kw:kw + W, :]                          # (HP, W, TC)
        for t, (kh, kw_t) in enumerate(taps):
            if kw_t != kw:
                continue
            patch = col[kh:kh + TH].reshape(TH * W, TC)
            d = jnp.dot(patch, w_ref[t], preferred_element_type=jnp.float32)
            part = d if part is None else part + d

    if n_c > 1:
        @pl.when(c == 0)
        def _():
            acc_ref[...] = part

        @pl.when(c > 0)
        def _():
            acc_ref[...] = acc_ref[...] + part

    # ---- epilogue: folded conv-bias/BatchNorm affine + optional ReLU, stored as a
    #      lane-dense flat (1, TH*W, Cout) block ----
    @pl.when(c == n_c - 1)
    def _():
        total = acc_ref[...] if n_c > 1 else part
        out = total * s_ref[...] + b_ref[...]
        if relu:
            out = jnp.maximum(out, 0.0)
        o_ref[...] = out.reshape((1,) + out.shape).astype(o_ref.dtype)


def _pick_tiles(N, H, W, Cin, Cout, ntaps, pad, isz, osz, plan,
                tile_rows=None, cin_tile=None):
    # ---- Cin (reduction) tile: keep the double-buffered weight block within budget,
    #      splitting only in MXU-width (256) multiples ----
    if cin_tile is not None:
        TC = cin_tile
    else:
        TC = Cin
        k = plan['mxu_k']
        if 2 * ntaps * Cin * Cout * isz > plan['weight'] and Cin % k == 0:
            while (2 * ntaps * TC * Cout * isz > plan['weight']
                   and TC > k and (TC // 2) % k == 0):
                TC //= 2
    assert Cin % TC == 0
    n_c = Cin // TC

    def est(th):
        hp, wp = th + 2 * pad, W + 2 * pad
        thw = th * W
        cpad = _round_up(Cout, 128)
        b = 2 * thw * TC * isz                    # pipelined center block (x2 buffers)
        b += 4 * pad * W * TC * isz               # halo blocks
        b += 2 * ntaps * TC * Cout * isz          # weights
        b += 2 * thw * Cout * osz                 # output block
        b += hp * wp * TC * isz                   # zero-padded scratch tile
        if n_c > 1:
            b += thw * cpad * 4                   # f32 reduction accumulator
        b += 2 * thw * TC * isz                   # per-kw repack temporaries
        b += 2 * thw * cpad * 4                   # f32 partial / epilogue temporaries
        b += 16 * Cout * 4
        return b

    if tile_rows is not None:
        return tile_rows, TC

    cands = [d for d in range(1, H + 1) if H % d == 0]

    def ok(th, need_parallel):
        if th < pad or th % pad != 0:
            return False
        if th != H and (th * W) % 8 != 0:
            return False
        if need_parallel and N * (H // th) < plan['min_parallel']:
            return False
        return est(th) <= plan['cap']

    feas = [d for d in sorted(cands, reverse=True) if ok(d, True)]
    if not feas:
        feas = [d for d in sorted(cands, reverse=True) if ok(d, False)]
    if not feas:
        feas = [min(d for d in cands if d >= pad and d % pad == 0)]
    return feas[0], TC


def conv2d_taps(x, w, scale, bias, *, taps, pad, relu, out_dtype=None,
                tile_rows=None, cin_tile=None):
    """x: (N,H,W,Cin) NHWC bf16.  w: (ntaps,Cin,Cout) bf16.  scale/bias: (1,Cout) f32."""
    N, H, W, Cin = x.shape
    ntaps, _, Cout = w.shape
    assert pad >= 1 and H % pad == 0
    odt = x.dtype if out_dtype is None else out_dtype
    plan = _chip_plan()
    TH, TC = _pick_tiles(N, H, W, Cin, Cout, ntaps, pad, x.dtype.itemsize,
                         jnp.dtype(odt).itemsize, plan,
                         tile_rows=tile_rows, cin_tile=cin_tile)
    n_h = H // TH
    n_c = Cin // TC
    THW = TH * W
    hb = TH // pad                 # halo row blocks per tile
    nrb = H // pad - 1             # last valid halo row-block index

    kern = functools.partial(_tap_conv_kernel, taps=tuple(taps), TH=TH, W=W,
                             pad=pad, n_c=n_c, relu=relu)
    scratch = [pltpu.VMEM((TH + 2 * pad, W + 2 * pad, TC), x.dtype)]
    if n_c > 1:
        scratch.append(pltpu.VMEM((THW, Cout), jnp.float32))

    flat = pl.pallas_call(
        kern,
        out_shape=jax.ShapeDtypeStruct((N, H * W, Cout), odt),
        grid=(N, n_h, n_c),
        in_specs=[
            pl.BlockSpec((1, TH, W, TC), lambda n, h, c: (n, h, 0, c)),
            pl.BlockSpec((1, pad, W, TC),
                         lambda n, h, c: (n, jnp.maximum(h * hb - 1, 0), 0, c)),
            pl.BlockSpec((1, pad, W, TC),
                         lambda n, h, c: (n, jnp.minimum((h + 1) * hb, nrb), 0, c)),
            pl.BlockSpec((ntaps, TC, Cout), lambda n, h, c: (0, c, 0)),
            pl.BlockSpec((1, Cout), lambda n, h, c: (0, 0)),
            pl.BlockSpec((1, Cout), lambda n, h, c: (0, 0)),
        ],
        out_specs=pl.BlockSpec((1, THW, Cout), lambda n, h, c: (n, h, 0)),
        scratch_shapes=scratch,
        compiler_params=pltpu.CompilerParams(
            dimension_semantics=("parallel", "parallel", "arbitrary"),
            vmem_limit_bytes=plan['vmem_limit']),
    )(x, x, x, w, scale, bias)
    return flat.reshape(N, H, W, Cout)


def conv2d_taps_ref(x, w, scale, bias, *, taps, pad, relu):
    """Pure-JAX reference for conv2d_taps (f32)."""
    N, H, W_, Cin = x.shape
    xp = jnp.pad(x.astype(jnp.float32), ((0, 0), (pad, pad), (pad, pad), (0, 0)))
    out = 0.0
    for t, (kh, kw) in enumerate(taps):
        patch = xp[:, kh:kh + H, kw:kw + W_, :]
        out = out + jnp.einsum('nhwc,cd->nhwd', patch, w[t].astype(jnp.float32))
    out = out * scale.reshape(1, 1, 1, -1) + bias.reshape(1, 1, 1, -1)
    if relu:
        out = jnp.maximum(out, 0.0)
    return out


# ---------------------------------------------------------------------------
# CBAM ChannelGate: row-chunked global avg & max pool -> shared MLP (both pooled
# vectors in one (2, C) matmul) -> sum -> sigmoid.  Emits only the (1, C) gate;
# the rescale happens in the fused spatial kernel below.
# ---------------------------------------------------------------------------
def _pool_chunk(H, W, C):
    budget = 1 << 20
    best = 1
    for d in range(1, H + 1):
        if H % d == 0 and d * W * C * 4 <= budget:
            best = d
    return best


def _channel_gate_kernel(x_ref, w1_ref, b1_ref, w2_ref, b2_ref, o_ref, *, CH):
    _, H, W, C = x_ref.shape
    nch = H // CH

    def body(i, carry):
        s, m = carry
        blk = x_ref[0, pl.ds(i * CH, CH)].astype(jnp.float32).reshape(CH * W, C)
        return (s + jnp.sum(blk, axis=0, keepdims=True),
                jnp.maximum(m, jnp.max(blk, axis=0, keepdims=True)))

    s0 = jnp.zeros((1, C), jnp.float32)
    m0 = jnp.full((1, C), -jnp.inf, jnp.float32)
    s, m = jax.lax.fori_loop(0, nch, body, (s0, m0))
    avg = s * (1.0 / float(H * W))
    pooled = jnp.concatenate([avg, m], axis=0)                     # (2, C)
    hid = jnp.dot(pooled, w1_ref[...], preferred_element_type=jnp.float32) + b1_ref[...]
    hid = jnp.maximum(hid, 0.0)
    att = jnp.dot(hid, w2_ref[...], preferred_element_type=jnp.float32) + b2_ref[...]
    att = att[0:1, :] + att[1:2, :]                                # sum over pool types
    o_ref[...] = (1.0 / (1.0 + jnp.exp(-att))).reshape(1, 1, C)


def channel_gate(p, x):
    N, H, W, C = x.shape
    hid = p['w1'].shape[1]
    CH = _pool_chunk(H, W, C)
    plan = _chip_plan()
    est = 2 * H * W * C * x.dtype.itemsize + 4 * CH * W * C * 4 + 8 * C * hid * 4
    return pl.pallas_call(
        functools.partial(_channel_gate_kernel, CH=CH),
        out_shape=jax.ShapeDtypeStruct((N, 1, C), jnp.float32),
        grid=(N,),
        in_specs=[
            pl.BlockSpec((1, H, W, C), lambda n: (n, 0, 0, 0)),
            pl.BlockSpec((C, hid), lambda n: (0, 0)),
            pl.BlockSpec((1, hid), lambda n: (0, 0)),
            pl.BlockSpec((hid, C), lambda n: (0, 0)),
            pl.BlockSpec((1, C), lambda n: (0, 0)),
        ],
        out_specs=pl.BlockSpec((1, 1, C), lambda n: (n, 0, 0)),
        compiler_params=pltpu.CompilerParams(
            dimension_semantics=("parallel",),
            vmem_limit_bytes=_vmem_limit(est, plan)),
    )(x, p['w1'], p['b1'], p['w2'], p['b2'])


# ---------------------------------------------------------------------------
# Fused CBAM apply: channel rescale + ChannelPool (max/mean over C) + 7x7 spatial
# conv (BN folded, VPU taps with SMEM scalar weights, kw lane shifts hoisted) +
# sigmoid + spatial rescale.  Reads and writes the activation exactly once.
# ---------------------------------------------------------------------------
def _cbam_apply_kernel(x_ref, g_ref, w_ref, o_ref, pmax_ref, pmean_ref, gat_ref,
                       *, K, CH):
    _, H, W, C = x_ref.shape
    pad = (K - 1) // 2
    nch = H // CH
    cg = g_ref[0]                                    # (1, C) f32 channel gate

    pmax_ref[...] = jnp.zeros_like(pmax_ref)
    pmean_ref[...] = jnp.zeros_like(pmean_ref)

    @pl.loop(0, nch)
    def _(i):
        r0 = i * CH
        xg = x_ref[0, pl.ds(r0, CH)].astype(jnp.float32) * cg     # (CH, W, C)
        pmax_ref[pl.ds(pad + r0, CH), pad:pad + W] = jnp.max(xg, axis=-1)
        pmean_ref[pl.ds(pad + r0, CH), pad:pad + W] = jnp.mean(xg, axis=-1)

    # 7x7 conv on the two pooled maps; kw (lane) shifts hoisted out of the kh loop.
    acc = jnp.full((H, W), w_ref[2 * K * K], jnp.float32)          # folded BN bias
    for kw in range(K):
        pmx = pmax_ref[:, kw:kw + W]
        pmn = pmean_ref[:, kw:kw + W]
        for kh in range(K):
            acc = acc + pmx[kh:kh + H] * w_ref[kh * K + kw]
            acc = acc + pmn[kh:kh + H] * w_ref[K * K + kh * K + kw]
    gat_ref[...] = 1.0 / (1.0 + jnp.exp(-acc))

    @pl.loop(0, nch)
    def _(i):
        r0 = i * CH
        xg = x_ref[0, pl.ds(r0, CH)].astype(jnp.float32) * cg
        g = gat_ref[pl.ds(r0, CH), :]
        o_ref[0, pl.ds(r0, CH)] = (xg * g[:, :, None]).astype(o_ref.dtype)


def cbam_apply(p_sg, x, gate, K=7):
    N, H, W, C = x.shape
    pad = (K - 1) // 2
    CH = _pool_chunk(H, W, C)
    plan = _chip_plan()
    est = (4 * H * W * C * x.dtype.itemsize + 3 * (H + 2 * pad) * (W + 2 * pad) * 4
           + H * W * 4 + 4 * CH * W * C * 4)
    return pl.pallas_call(
        functools.partial(_cbam_apply_kernel, K=K, CH=CH),
        out_shape=jax.ShapeDtypeStruct((N, H, W, C), x.dtype),
        grid=(N,),
        in_specs=[
            pl.BlockSpec((1, H, W, C), lambda n: (n, 0, 0, 0)),
            pl.BlockSpec((1, 1, C), lambda n: (n, 0, 0)),
            pl.BlockSpec(memory_space=pltpu.MemorySpace.SMEM),     # (2*K*K + 1,) scalars
        ],
        out_specs=pl.BlockSpec((1, H, W, C), lambda n: (n, 0, 0, 0)),
        scratch_shapes=[
            pltpu.VMEM((H + 2 * pad, W + 2 * pad), jnp.float32),
            pltpu.VMEM((H + 2 * pad, W + 2 * pad), jnp.float32),
            pltpu.VMEM((H, W), jnp.float32),
        ],
        compiler_params=pltpu.CompilerParams(
            dimension_semantics=("parallel",),
            vmem_limit_bytes=_vmem_limit(est, plan)),
    )(x, gate, p_sg['wsg'])


def cbam_ref(p, x):
    """Pure-JAX reference for ChannelGate + SpatialGate on NHWC input (f32)."""
    xf = x.astype(jnp.float32)
    N, H, W, C = x.shape
    avg = xf.mean(axis=(1, 2))
    mx = xf.max(axis=(1, 2))

    def mlp(v):
        h = jnp.maximum(v @ p['cg']['w1'] + p['cg']['b1'], 0.0)
        return h @ p['cg']['w2'] + p['cg']['b2']

    cg = jax.nn.sigmoid(mlp(avg) + mlp(mx))[:, None, None, :]
    xg = xf * cg
    pooled = jnp.stack([xg.max(axis=-1), xg.mean(axis=-1)], axis=-1)   # (N,H,W,2)
    wsg = p['sg']['wsg']
    wmax = wsg[:49].reshape(7, 7)
    wmean = wsg[49:98].reshape(7, 7)
    pp = jnp.pad(pooled, ((0, 0), (3, 3), (3, 3), (0, 0)))
    conv = jnp.zeros((N, H, W), jnp.float32) + wsg[98]
    for kh in range(7):
        for kw in range(7):
            conv = conv + pp[:, kh:kh + H, kw:kw + W, 0] * wmax[kh, kw]
            conv = conv + pp[:, kh:kh + H, kw:kw + W, 1] * wmean[kh, kw]
    return xg * jax.nn.sigmoid(conv)[..., None]


# ---------------------------------------------------------------------------
# JAX glue: bilinear 2x upsample (align_corners=True), CBAM-SSPCAB, forward
# ---------------------------------------------------------------------------
def _interp_matrix(n_in, n_out):
    idx = jnp.arange(n_out, dtype=jnp.float32)
    src = jnp.zeros((n_out,), jnp.float32) if n_out == 1 else idx * (n_in - 1) / (n_out - 1)
    lo = jnp.clip(jnp.floor(src).astype(jnp.int32), 0, n_in - 1)
    hi = jnp.clip(lo + 1, 0, n_in - 1)
    w_hi = src - lo.astype(jnp.float32)
    w_lo = 1.0 - w_hi
    A = jnp.zeros((n_out, n_in), jnp.float32)
    A = A.at[jnp.arange(n_out), lo].add(w_lo)
    A = A.at[jnp.arange(n_out), hi].add(w_hi)
    return A


def bilinear_up2(x):
    # nn.Upsample(scale_factor=2, mode='bilinear', align_corners=True) as two
    # separable bf16 matmuls with f32 accumulation (no f32 intermediates in HBM).
    N, H, W, C = x.shape
    Ah = _interp_matrix(H, 2 * H).astype(x.dtype)
    Aw = _interp_matrix(W, 2 * W).astype(x.dtype)
    y = jnp.einsum('oh,nhwc->nowc', Ah, x,
                   preferred_element_type=jnp.float32).astype(x.dtype)
    y = jnp.einsum('pw,nowc->nopc', Aw, y,
                   preferred_element_type=jnp.float32).astype(x.dtype)
    return y


def cbam_sspcab(p, x):
    """CBAMSSPCAB (kernel_dim=1, dilation=1): the four shifted 1x1 convs + sum + ReLU
    collapse to ONE sparse-tap conv (corner taps of a 5x5 window, pad=2), followed by
    CBAM (ChannelGate emits the gate; one fused kernel applies both gates)."""
    x = conv2d_taps(x, p['conv']['w'], p['conv']['scale'], p['conv']['bias'],
                    taps=SSPCAB_TAPS, pad=2, relu=True)
    gate = channel_gate(p['cg'], x)
    return cbam_apply(p['sg'], x, gate)


def _pad_cout_params(p, to=128):
    w, s, b = p['w'], p['scale'], p['bias']
    ntaps, cin, cout = w.shape
    if cout >= to:
        return p, cout
    wp = jnp.zeros((ntaps, cin, to), w.dtype).at[:, :, :cout].set(w)
    sp = jnp.zeros((1, to), s.dtype).at[:, :cout].set(s)
    bp = jnp.zeros((1, to), b.dtype).at[:, :cout].set(b)
    return {'w': wp, 'scale': sp, 'bias': bp}, cout


def decoder_forward(params, b5_nchw):
    x = jnp.transpose(b5_nchw, (0, 2, 3, 1)).astype(jnp.bfloat16)   # NCHW -> NHWC bf16

    def conv3(p, x, relu=True, out_dtype=None):
        return conv2d_taps(x, p['w'], p['scale'], p['bias'],
                           taps=DENSE3_TAPS, pad=1, relu=relu, out_dtype=out_dtype)

    x = conv3(params['up1'], bilinear_up2(x))          # up1
    x = conv3(params['db1a'], x)                       # db1
    x = conv3(params['db1b'], x)
    x = conv3(params['up2'], bilinear_up2(x))          # up2
    x = conv3(params['db2a'], x)                       # db2
    x = conv3(params['db2b'], x)
    x = conv3(params['up3'], bilinear_up2(x))          # up3
    x = conv3(params['db3a'], x)                       # db3
    x = conv3(params['db3b'], x)
    x = cbam_sspcab(params['csp3'], x)                 # cbamsspcab3
    x = conv3(params['up4'], bilinear_up2(x))          # up4
    x = conv3(params['db4a'], x)                       # db4
    x = conv3(params['db4b'], x)
    # fin_out: Cout padded to 128 lanes (unmasked stores, full MXU lanes), sliced back.
    finp, n_out = _pad_cout_params(params['fin'])
    x = conv2d_taps(x, finp['w'], finp['scale'], finp['bias'],
                    taps=DENSE3_TAPS, pad=1, relu=False, out_dtype=jnp.float32)
    x = x[..., :n_out]
    return jnp.transpose(x, (0, 3, 1, 2))              # NHWC -> NCHW


# ---------------------------------------------------------------------------
# Deterministic synthetic parameters (BatchNorm folded in eval mode)
# ---------------------------------------------------------------------------
_BN_SCALE = 1.0 / math.sqrt(1.0 + 1e-5)   # gamma=1, beta=0, mean=0, var=1


def _conv_params(key, ntaps, cin, cout, *, bn=True, conv_bias=True):
    kw_, kb_ = jax.random.split(key)
    w = jax.random.normal(kw_, (ntaps, cin, cout), jnp.float32) / math.sqrt(cin * ntaps)
    cb = (0.01 * jax.random.normal(kb_, (cout,), jnp.float32)) if conv_bias \
        else jnp.zeros((cout,), jnp.float32)
    if bn:
        scale = jnp.full((cout,), _BN_SCALE, jnp.float32)
        bias = cb * _BN_SCALE
    else:
        scale = jnp.ones((cout,), jnp.float32)
        bias = cb
    return {'w': w.astype(jnp.bfloat16),
            'scale': scale.reshape(1, cout),
            'bias': bias.reshape(1, cout)}


def _spatial_gate_params(key):
    w = jax.random.normal(key, (7, 7, 2), jnp.float32) / math.sqrt(2 * 49)
    w = w * _BN_SCALE                          # fold eval-mode BN scale (bias == 0)
    flat = jnp.concatenate([w[:, :, 0].reshape(-1),      # 49 weights for max-pool map
                            w[:, :, 1].reshape(-1),      # 49 weights for mean-pool map
                            jnp.zeros((1,), jnp.float32)])  # folded bias
    return {'wsg': flat}


def _cbam_params(key, C):
    hid = max(C // 16, 1)
    k1, k2, k3, k4, k5 = jax.random.split(key, 5)
    cg = {'w1': jax.random.normal(k1, (C, hid), jnp.float32) / math.sqrt(C),
          'b1': (0.01 * jax.random.normal(k2, (hid,), jnp.float32)).reshape(1, hid),
          'w2': jax.random.normal(k3, (hid, C), jnp.float32) / math.sqrt(hid),
          'b2': (0.01 * jax.random.normal(k4, (C,), jnp.float32)).reshape(1, C)}
    return {'cg': cg, 'sg': _spatial_gate_params(k5)}


def make_params(key, base_width, out_channels=1):
    bw = base_width
    keys = iter(jax.random.split(key, 24))
    p = {}
    p['up1'] = _conv_params(next(keys), 9, bw * 8, bw * 8)
    p['db1a'] = _conv_params(next(keys), 9, bw * 8, bw * 8)
    p['db1b'] = _conv_params(next(keys), 9, bw * 8, bw * 4)
    p['up2'] = _conv_params(next(keys), 9, bw * 4, bw * 4)
    p['db2a'] = _conv_params(next(keys), 9, bw * 4, bw * 4)
    p['db2b'] = _conv_params(next(keys), 9, bw * 4, bw * 2)
    p['up3'] = _conv_params(next(keys), 9, bw * 2, bw * 2)
    p['db3a'] = _conv_params(next(keys), 9, bw * 2, bw * 2)
    p['db3b'] = _conv_params(next(keys), 9, bw * 2, bw * 1)

    C = bw   # CBAMSSPCAB channels tied to base_width (see TODO at top)
    csp = {}
    # four 1x1 convs fused into one (4, C, C) tap weight; their biases sum.
    csp['conv'] = _conv_params(next(keys), 4, C, C, bn=False, conv_bias=True)
    csp.update(_cbam_params(next(keys), C))
    p['csp3'] = csp

    p['up4'] = _conv_params(next(keys), 9, bw, bw)
    p['db4a'] = _conv_params(next(keys), 9, bw, bw)
    p['db4b'] = _conv_params(next(keys), 9, bw, bw)
    p['fin'] = _conv_params(next(keys), 9, bw, out_channels, bn=False, conv_bias=True)
    return p


# ---------------------------------------------------------------------------
if __name__ == "__main__":
    # --- correctness probes: exercise multi-row-tile halos, the Cin-split reduction
    #     path, SSPCAB corner taps and the fused CBAM kernels (the small forward pass
    #     below only hits single-tile grids) ---
    xa = jax.random.normal(jax.random.PRNGKey(1), (1, 16, 8, 256),
                           jnp.float32).astype(jnp.bfloat16)
    pa = _conv_params(jax.random.PRNGKey(2), 9, 256, 64)
    got = conv2d_taps(xa, pa['w'], pa['scale'], pa['bias'], taps=DENSE3_TAPS,
                      pad=1, relu=True, tile_rows=4, cin_tile=128)
    want = conv2d_taps_ref(xa, pa['w'], pa['scale'], pa['bias'],
                           taps=DENSE3_TAPS, pad=1, relu=True)
    err = float(jnp.max(jnp.abs(got.astype(jnp.float32) - want)))
    assert err < 5e-2, f"dense3 tap-conv mismatch: {err}"

    xb = jax.random.normal(jax.random.PRNGKey(3), (1, 16, 8, 128),
                           jnp.float32).astype(jnp.bfloat16)
    pb = _conv_params(jax.random.PRNGKey(4), 4, 128, 128, bn=False)
    got = conv2d_taps(xb, pb['w'], pb['scale'], pb['bias'], taps=SSPCAB_TAPS,
                      pad=2, relu=True, tile_rows=8)
    want = conv2d_taps_ref(xb, pb['w'], pb['scale'], pb['bias'],
                           taps=SSPCAB_TAPS, pad=2, relu=True)
    err = float(jnp.max(jnp.abs(got.astype(jnp.float32) - want)))
    assert err < 5e-2, f"sspcab tap-conv mismatch: {err}"

    xc = jax.random.normal(jax.random.PRNGKey(5), (2, 16, 16, 128),
                           jnp.float32).astype(jnp.bfloat16)
    pc = _cbam_params(jax.random.PRNGKey(6), 128)
    gate = channel_gate(pc['cg'], xc)
    got = cbam_apply(pc['sg'], xc, gate)
    want = cbam_ref(pc, xc)
    err = float(jnp.max(jnp.abs(got.astype(jnp.float32) - want)))
    assert err < 5e-2, f"cbam mismatch: {err}"

    # --- full decoder forward at small shapes ---
    key = jax.random.PRNGKey(0)
    kp, kx = jax.random.split(key)
    base_width = 32
    N, H, W = 2, 4, 4                          # b5 spatial; output is 16x upsampled
    params = make_params(kp, base_width, out_channels=1)
    b5 = jax.random.normal(kx, (N, base_width * 8, H, W), jnp.float32)

    fwd = jax.jit(decoder_forward)
    out = jax.block_until_ready(fwd(params, b5))

    assert out.shape == (N, 1, 16 * H, 16 * W), out.shape
    assert bool(jnp.all(jnp.isfinite(out)))
    print("KERNEL_OK")
</pallas_src>

<mosaic_0001>
module attributes {stable_mosaic.version = 11 : i64} {
  func.func @_tap_conv_kernel(%arg0: i32, %arg1: i32, %arg2: i32, %arg3: memref<1x4x8x128xbf16, #tpu.memory_space<vmem>>, %arg4: memref<1x1x8x128xbf16, #tpu.memory_space<vmem>>, %arg5: memref<1x1x8x128xbf16, #tpu.memory_space<vmem>>, %arg6: memref<9x128x64xbf16, #tpu.memory_space<vmem>>, %arg7: memref<1x64xf32, #tpu.memory_space<vmem>>, %arg8: memref<1x64xf32, #tpu.memory_space<vmem>>, %arg9: memref<1x32x64xbf16, #tpu.memory_space<vmem>>, %arg10: memref<6x10x128xbf16, #tpu.memory_space<vmem>>, %arg11: memref<32x64xf32, #tpu.memory_space<vmem>>) attributes {dimension_semantics = [#tpu.dimension_semantics<parallel>, #tpu.dimension_semantics<parallel>, #tpu.dimension_semantics<arbitrary>], iteration_bounds = array<i64: 1, 4, 2>, scalar_prefetch = 0 : i64, scratch_operands = 2 : i64, tpu.core_type = #tpu.core_type<tc>, window_params = [{transform_indices = @transform_0, window_bounds = array<i64: 1, 4, 8, 128>}, {transform_indices = @transform_1, window_bounds = array<i64: 1, 1, 8, 128>}, {transform_indices = @transform_2, window_bounds = array<i64: 1, 1, 8, 128>}, {transform_indices = @transform_3, window_bounds = array<i64: 9, 128, 64>}, {pipeline_mode = #tpu.pipeline_mode<synchronous>, transform_indices = @transform_4, window_bounds = array<i64: 1, 64>}, {pipeline_mode = #tpu.pipeline_mode<synchronous>, transform_indices = @transform_5, window_bounds = array<i64: 1, 64>}, {transform_indices = @transform_6, window_bounds = array<i64: 1, 32, 64>}]} {
    %c0_i32 = arith.constant 0 : i32
    %0 = arith.cmpi eq, %arg2, %c0_i32 : i32
    %1 = arith.extui %0 : i1 to i32
    %c0_i32_0 = arith.constant 0 : i32
    %2 = arith.cmpi ne, %1, %c0_i32_0 : i32
    scf.if %2 {
      %cst_51 = arith.constant 0.000000e+00 : bf16
      %77 = vector.broadcast %cst_51 : bf16 to vector<6x1x128xbf16>
      %c0_52 = arith.constant 0 : index
      %c0_53 = arith.constant 0 : index
      %c0_54 = arith.constant 0 : index
      %78 = vector.load %arg10[%c0_52, %c0_53, %c0_54] : memref<6x10x128xbf16, #tpu.memory_space<vmem>>, vector<6x1x128xbf16>
      tpu.vector_store %arg10[%c0_52, %c0_53, %c0_54], %77 {strides = array<i32>} : memref<6x10x128xbf16, #tpu.memory_space<vmem>>, vector<6x1x128xbf16>,
      %c0_55 = arith.constant 0 : index
      %c9 = arith.constant 9 : index
      %c0_56 = arith.constant 0 : index
      %79 = vector.load %arg10[%c0_55, %c9, %c0_56] : memref<6x10x128xbf16, #tpu.memory_space<vmem>>, vector<6x1x128xbf16>
      tpu.vector_store %arg10[%c0_55, %c9, %c0_56], %77 {strides = array<i32>} : memref<6x10x128xbf16, #tpu.memory_space<vmem>>, vector<6x1x128xbf16>,
      %cst_57 = arith.constant 0.000000e+00 : bf16
      %80 = vector.broadcast %cst_57 : bf16 to vector<1x8x128xbf16>
      %c0_i32_58 = arith.constant 0 : i32
      %81 = arith.cmpi eq, %arg1, %c0_i32_58 : i32
      %82 = arith.extui %81 : i1 to i32
      %c0_i32_59 = arith.constant 0 : i32
      %83 = arith.cmpi ne, %82, %c0_i32_59 : i32
      scf.if %83 {
        %c0_62 = arith.constant 0 : index
        %c1_63 = arith.constant 1 : index
        %c0_64 = arith.constant 0 : index
        %87 = vector.load %arg10[%c0_62, %c1_63, %c0_64] : memref<6x10x128xbf16, #tpu.memory_space<vmem>>, vector<1x8x128xbf16>
        tpu.vector_store %arg10[%c0_62, %c1_63, %c0_64], %80 {strides = array<i32>} : memref<6x10x128xbf16, #tpu.memory_space<vmem>>, vector<1x8x128xbf16>,
      } else {
      }
      %c3_i32_60 = arith.constant 3 : i32
      %84 = arith.cmpi eq, %arg1, %c3_i32_60 : i32
      %85 = arith.extui %84 : i1 to i32
      %c0_i32_61 = arith.constant 0 : i32
      %86 = arith.cmpi ne, %85, %c0_i32_61 : i32
      scf.if %86 {
        %c5_62 = arith.constant 5 : index
        %c1_63 = arith.constant 1 : index
        %c0_64 = arith.constant 0 : index
        %87 = vector.load %arg10[%c5_62, %c1_63, %c0_64] : memref<6x10x128xbf16, #tpu.memory_space<vmem>>, vector<1x8x128xbf16>
        tpu.vector_store %arg10[%c5_62, %c1_63, %c0_64], %80 {strides = array<i32>} : memref<6x10x128xbf16, #tpu.memory_space<vmem>>, vector<1x8x128xbf16>,
      } else {
      }
    } else {
    }
    %c0_i32_1 = arith.constant 0 : i32
    %3 = arith.cmpi sgt, %arg1, %c0_i32_1 : i32
    %4 = arith.extui %3 : i1 to i32
    %c0_i32_2 = arith.constant 0 : i32
    %5 = arith.cmpi ne, %4, %c0_i32_2 : i32
    scf.if %5 {
      %c0_51 = arith.constant 0 : index
      %c0_52 = arith.constant 0 : index
      %c0_53 = arith.constant 0 : index
      %c0_54 = arith.constant 0 : index
      %77 = vector.load %arg4[%c0_51, %c0_52, %c0_53, %c0_54] : memref<1x1x8x128xbf16, #tpu.memory_space<vmem>>, vector<1x1x8x128xbf16>
      %78 = vector.shape_cast %77 : vector<1x1x8x128xbf16> to vector<1x8x128xbf16>
      %c0_55 = arith.constant 0 : index
      %c1_56 = arith.constant 1 : index
      %c0_57 = arith.constant 0 : index
      %79 = vector.load %arg10[%c0_55, %c1_56, %c0_57] : memref<6x10x128xbf16, #tpu.memory_space<vmem>>, vector<1x8x128xbf16>
      tpu.vector_store %arg10[%c0_55, %c1_56, %c0_57], %78 {strides = array<i32>} : memref<6x10x128xbf16, #tpu.memory_space<vmem>>, vector<1x8x128xbf16>,
    } else {
    }
    %c3_i32 = arith.constant 3 : i32
    %6 = arith.cmpi slt, %arg1, %c3_i32 : i32
    %7 = arith.extui %6 : i1 to i32
    %c0_i32_3 = arith.constant 0 : i32
    %8 = arith.cmpi ne, %7, %c0_i32_3 : i32
    scf.if %8 {
      %c0_51 = arith.constant 0 : index
      %c0_52 = arith.constant 0 : index
      %c0_53 = arith.constant 0 : index
      %c0_54 = arith.constant 0 : index
      %77 = vector.load %arg5[%c0_51, %c0_52, %c0_53, %c0_54] : memref<1x1x8x128xbf16, #tpu.memory_space<vmem>>, vector<1x1x8x128xbf16>
      %78 = vector.shape_cast %77 : vector<1x1x8x128xbf16> to vector<1x8x128xbf16>
      %c5_55 = arith.constant 5 : index
      %c1_56 = arith.constant 1 : index
      %c0_57 = arith.constant 0 : index
      %79 = vector.load %arg10[%c5_55, %c1_56, %c0_57] : memref<6x10x128xbf16, #tpu.memory_space<vmem>>, vector<1x8x128xbf16>
      tpu.vector_store %arg10[%c5_55, %c1_56, %c0_57], %78 {strides = array<i32>} : memref<6x10x128xbf16, #tpu.memory_space<vmem>>, vector<1x8x128xbf16>,
    } else {
    }
    %c0 = arith.constant 0 : index
    %c0_4 = arith.constant 0 : index
    %c0_5 = arith.constant 0 : index
    %c0_6 = arith.constant 0 : index
    %9 = vector.load %arg3[%c0, %c0_4, %c0_5, %c0_6] : memref<1x4x8x128xbf16, #tpu.memory_space<vmem>>, vector<1x4x8x128xbf16>
    %10 = vector.shape_cast %9 : vector<1x4x8x128xbf16> to vector<4x8x128xbf16>
    %c1 = arith.constant 1 : index
    %c1_7 = arith.constant 1 : index
    %c0_8 = arith.constant 0 : index
    %11 = vector.load %arg10[%c1, %c1_7, %c0_8] : memref<6x10x128xbf16, #tpu.memory_space<vmem>>, vector<4x8x128xbf16>
    tpu.vector_store %arg10[%c1, %c1_7, %c0_8], %10 {strides = array<i32>} : memref<6x10x128xbf16, #tpu.memory_space<vmem>>, vector<4x8x128xbf16>,
    %c0_9 = arith.constant 0 : index
    %c0_10 = arith.constant 0 : index
    %c0_11 = arith.constant 0 : index
    %12 = vector.load %arg10[%c0_9, %c0_10, %c0_11] : memref<6x10x128xbf16, #tpu.memory_space<vmem>>, vector<6x8x128xbf16>
    %13 = vector.extract_strided_slice %12 {offsets = [0, 0, 0], sizes = [4, 8, 128], strides = [1, 1, 1]} : vector<6x8x128xbf16> to vector<4x8x128xbf16>
    %14 = vector.shape_cast %13 : vector<4x8x128xbf16> to vector<32x128xbf16>
    %c0_12 = arith.constant 0 : index
    %c0_13 = arith.constant 0 : index
    %c0_14 = arith.constant 0 : index
    %15 = vector.load %arg6[%c0_12, %c0_13, %c0_14] : memref<9x128x64xbf16, #tpu.memory_space<vmem>>, vector<1x128x64xbf16>
    %16 = vector.shape_cast %15 : vector<1x128x64xbf16> to vector<128x64xbf16>
    %cst = arith.constant dense<0.000000e+00> : vector<32x64xf32>
    %17 = tpu.matmul %14, %16, %cst {dimension_numbers = #tpu.dot_dimension_numbers<[1], [0], [0], [1], [0, 0, 1, 1], [], []>} : vector<32x128xbf16>, vector<128x64xbf16>, vector<32x64xf32> -> vector<32x64xf32>
    %18 = vector.extract_strided_slice %12 {offsets = [1, 0, 0], sizes = [4, 8, 128], strides = [1, 1, 1]} : vector<6x8x128xbf16> to vector<4x8x128xbf16>
    %19 = vector.shape_cast %18 : vector<4x8x128xbf16> to vector<32x128xbf16>
    %c3 = arith.constant 3 : index
    %c0_15 = arith.constant 0 : index
    %c0_16 = arith.constant 0 : index
    %20 = vector.load %arg6[%c3, %c0_15, %c0_16] : memref<9x128x64xbf16, #tpu.memory_space<vmem>>, vector<1x128x64xbf16>
    %21 = vector.shape_cast %20 : vector<1x128x64xbf16> to vector<128x64xbf16>
    %cst_17 = arith.constant dense<0.000000e+00> : vector<32x64xf32>
    %22 = tpu.matmul %19, %21, %cst_17 {dimension_numbers = #tpu.dot_dimension_numbers<[1], [0], [0], [1], [0, 0, 1, 1], [], []>} : vector<32x128xbf16>, vector<128x64xbf16>, vector<32x64xf32> -> vector<32x64xf32>
    %23 = arith.addf %17, %22 : vector<32x64xf32>
    %24 = vector.extract_strided_slice %12 {offsets = [2, 0, 0], sizes = [4, 8, 128], strides = [1, 1, 1]} : vector<6x8x128xbf16> to vector<4x8x128xbf16>
    %25 = vector.shape_cast %24 : vector<4x8x128xbf16> to vector<32x128xbf16>
    %c6 = arith.constant 6 : index
    %c0_18 = arith.constant 0 : index
    %c0_19 = arith.constant 0 : index
    %26 = vector.load %arg6[%c6, %c0_18, %c0_19] : memref<9x128x64xbf16, #tpu.memory_space<vmem>>, vector<1x128x64xbf16>
    %27 = vector.shape_cast %26 : vector<1x128x64xbf16> to vector<128x64xbf16>
    %cst_20 = arith.constant dense<0.000000e+00> : vector<32x64xf32>
    %28 = tpu.matmul %25, %27, %cst_20 {dimension_numbers = #tpu.dot_dimension_numbers<[1], [0], [0], [1], [0, 0, 1, 1], [], []>} : vector<32x128xbf16>, vector<128x64xbf16>, vector<32x64xf32> -> vector<32x64xf32>
    %29 = arith.addf %23, %28 : vector<32x64xf32>
    %c0_21 = arith.constant 0 : index
    %c1_22 = arith.constant 1 : index
    %c0_23 = arith.constant 0 : index
    %30 = vector.load %arg10[%c0_21, %c1_22, %c0_23] : memref<6x10x128xbf16, #tpu.memory_space<vmem>>, vector<6x8x128xbf16>
    %31 = vector.extract_strided_slice %30 {offsets = [0, 0, 0], sizes = [4, 8, 128], strides = [1, 1, 1]} : vector<6x8x128xbf16> to vector<4x8x128xbf16>
    %32 = vector.shape_cast %31 : vector<4x8x128xbf16> to vector<32x128xbf16>
    %c1_24 = arith.constant 1 : index
    %c0_25 = arith.constant 0 : index
    %c0_26 = arith.constant 0 : index
    %33 = vector.load %arg6[%c1_24, %c0_25, %c0_26] : memref<9x128x64xbf16, #tpu.memory_space<vmem>>, vector<1x128x64xbf16>
    %34 = vector.shape_cast %33 : vector<1x128x64xbf16> to vector<128x64xbf16>
    %cst_27 = arith.constant dense<0.000000e+00> : vector<32x64xf32>
    %35 = tpu.matmul %32, %34, %cst_27 {dimension_numbers = #tpu.dot_dimension_numbers<[1], [0], [0], [1], [0, 0, 1, 1], [], []>} : vector<32x128xbf16>, vector<128x64xbf16>, vector<32x64xf32> -> vector<32x64xf32>
    %36 = arith.addf %29, %35 : vector<32x64xf32>
    %37 = vector.extract_strided_slice %30 {offsets = [1, 0, 0], sizes = [4, 8, 128], strides = [1, 1, 1]} : vector<6x8x128xbf16> to vector<4x8x128xbf16>
    %38 = vector.shape_cast %37 : vector<4x8x128xbf16> to vector<32x128xbf16>
    %c4 = arith.constant 4 : index
    %c0_28 = arith.constant 0 : index
    %c0_29 = arith.constant 0 : index
    %39 = vector.load %arg6[%c4, %c0_28, %c0_29] : memref<9x128x64xbf16, #tpu.memory_space<vmem>>, vector<1x128x64xbf16>
    %40 = vector.shape_cast %39 : vector<1x128x64xbf16> to vector<128x64xbf16>
    %cst_30 = arith.constant dense<0.000000e+00> : vector<32x64xf32>
    %41 = tpu.matmul %38, %40, %cst_30 {dimension_numbers = #tpu.dot_dimension_numbers<[1], [0], [0], [1], [0, 0, 1, 1], [], []>} : vector<32x128xbf16>, vector<128x64xbf16>, vector<32x64xf32> -> vector<32x64xf32>
    %42 = arith.addf %36, %41 : vector<32x64xf32>
    %43 = vector.extract_strided_slice %30 {offsets = [2, 0, 0], sizes = [4, 8, 128], strides = [1, 1, 1]} : vector<6x8x128xbf16> to vector<4x8x128xbf16>
    %44 = vector.shape_cast %43 : vector<4x8x128xbf16> to vector<32x128xbf16>
    %c7 = arith.constant 7 : index
    %c0_31 = arith.constant 0 : index
    %c0_32 = arith.constant 0 : index
    %45 = vector.load %arg6[%c7, %c0_31, %c0_32] : memref<9x128x64xbf16, #tpu.memory_space<vmem>>, vector<1x128x64xbf16>
    %46 = vector.shape_cast %45 : vector<1x128x64xbf16> to vector<128x64xbf16>
    %cst_33 = arith.constant dense<0.000000e+00> : vector<32x64xf32>
    %47 = tpu.matmul %44, %46, %cst_33 {dimension_numbers = #tpu.dot_dimension_numbers<[1], [0], [0], [1], [0, 0, 1, 1], [], []>} : vector<32x128xbf16>, vector<128x64xbf16>, vector<32x64xf32> -> vector<32x64xf32>
    %48 = arith.addf %42, %47 : vector<32x64xf32>
    %c0_34 = arith.constant 0 : index
    %c2 = arith.constant 2 : index
    %c0_35 = arith.constant 0 : index
    %49 = vector.load %arg10[%c0_34, %c2, %c0_35] : memref<6x10x128xbf16, #tpu.memory_space<vmem>>, vector<6x8x128xbf16>
    %50 = vector.extract_strided_slice %49 {offsets = [0, 0, 0], sizes = [4, 8, 128], strides = [1, 1, 1]} : vector<6x8x128xbf16> to vector<4x8x128xbf16>
    %51 = vector.shape_cast %50 : vector<4x8x128xbf16> to vector<32x128xbf16>
    %c2_36 = arith.constant 2 : index
    %c0_37 = arith.constant 0 : index
    %c0_38 = arith.constant 0 : index
    %52 = vector.load %arg6[%c2_36, %c0_37, %c0_38] : memref<9x128x64xbf16, #tpu.memory_space<vmem>>, vector<1x128x64xbf16>
    %53 = vector.shape_cast %52 : vector<1x128x64xbf16> to vector<128x64xbf16>
    %cst_39 = arith.constant dense<0.000000e+00> : vector<32x64xf32>
    %54 = tpu.matmul %51, %53, %cst_39 {dimension_numbers = #tpu.dot_dimension_numbers<[1], [0], [0], [1], [0, 0, 1, 1], [], []>} : vector<32x128xbf16>, vector<128x64xbf16>, vector<32x64xf32> -> vector<32x64xf32>
    %55 = arith.addf %48, %54 : vector<32x64xf32>
    %56 = vector.extract_strided_slice %49 {offsets = [1, 0, 0], sizes = [4, 8, 128], strides = [1, 1, 1]} : vector<6x8x128xbf16> to vector<4x8x128xbf16>
    %57 = vector.shape_cast %56 : vector<4x8x128xbf16> to vector<32x128xbf16>
    %c5 = arith.constant 5 : index
    %c0_40 = arith.constant 0 : index
    %c0_41 = arith.constant 0 : index
    %58 = vector.load %arg6[%c5, %c0_40, %c0_41] : memref<9x128x64xbf16, #tpu.memory_space<vmem>>, vector<1x128x64xbf16>
    %59 = vector.shape_cast %58 : vector<1x128x64xbf16> to vector<128x64xbf16>
    %cst_42 = arith.constant dense<0.000000e+00> : vector<32x64xf32>
    %60 = tpu.matmul %57, %59, %cst_42 {dimension_numbers = #tpu.dot_dimension_numbers<[1], [0], [0], [1], [0, 0, 1, 1], [], []>} : vector<32x128xbf16>, vector<128x64xbf16>, vector<32x64xf32> -> vector<32x64xf32>
    %61 = arith.addf %55, %60 : vector<32x64xf32>
    %62 = vector.extract_strided_slice %49 {offsets = [2, 0, 0], sizes = [4, 8, 128], strides = [1, 1, 1]} : vector<6x8x128xbf16> to vector<4x8x128xbf16>
    %63 = vector.shape_cast %62 : vector<4x8x128xbf16> to vector<32x128xbf16>
    %c8 = arith.constant 8 : index
    %c0_43 = arith.constant 0 : index
    %c0_44 = arith.constant 0 : index
    %64 = vector.load %arg6[%c8, %c0_43, %c0_44] : memref<9x128x64xbf16, #tpu.memory_space<vmem>>, vector<1x128x64xbf16>
    %65 = vector.shape_cast %64 : vector<1x128x64xbf16> to vector<128x64xbf16>
    %cst_45 = arith.constant dense<0.000000e+00> : vector<32x64xf32>
    %66 = tpu.matmul %63, %65, %cst_45 {dimension_numbers = #tpu.dot_dimension_numbers<[1], [0], [0], [1], [0, 0, 1, 1], [], []>} : vector<32x128xbf16>, vector<128x64xbf16>, vector<32x64xf32> -> vector<32x64xf32>
    %67 = arith.addf %61, %66 : vector<32x64xf32>
    %c0_i32_46 = arith.constant 0 : i32
    %68 = arith.cmpi eq, %arg2, %c0_i32_46 : i32
    %69 = arith.extui %68 : i1 to i32
    %c0_i32_47 = arith.constant 0 : i32
    %70 = arith.cmpi ne, %69, %c0_i32_47 : i32
    scf.if %70 {
      %c0_51 = arith.constant 0 : index
      %c0_52 = arith.constant 0 : index
      %77 = vector.load %arg11[%c0_51, %c0_52] : memref<32x64xf32, #tpu.memory_space<vmem>>, vector<32x64xf32>
      tpu.vector_store %arg11[%c0_51, %c0_52], %67 {strides = array<i32>} : memref<32x64xf32, #tpu.memory_space<vmem>>, vector<32x64xf32>,
    } else {
    }
    %c0_i32_48 = arith.constant 0 : i32
    %71 = arith.cmpi sgt, %arg2, %c0_i32_48 : i32
    %72 = arith.extui %71 : i1 to i32
    %c0_i32_49 = arith.constant 0 : i32
    %73 = arith.cmpi ne, %72, %c0_i32_49 : i32
    scf.if %73 {
      %c0_51 = arith.constant 0 : index
      %c0_52 = arith.constant 0 : index
      %77 = vector.load %arg11[%c0_51, %c0_52] : memref<32x64xf32, #tpu.memory_space<vmem>>, vector<32x64xf32>
      %78 = arith.addf %77, %67 : vector<32x64xf32>
      %c0_53 = arith.constant 0 : index
      %c0_54 = arith.constant 0 : index
      %79 = vector.load %arg11[%c0_53, %c0_54] : memref<32x64xf32, #tpu.memory_space<vmem>>, vector<32x64xf32>
      tpu.vector_store %arg11[%c0_53, %c0_54], %78 {strides = array<i32>} : memref<32x64xf32, #tpu.memory_space<vmem>>, vector<32x64xf32>,
    } else {
    }
    %c1_i32 = arith.constant 1 : i32
    %74 = arith.cmpi eq, %arg2, %c1_i32 : i32
    %75 = arith.extui %74 : i1 to i32
    %c0_i32_50 = arith.constant 0 : i32
    %76 = arith.cmpi ne, %75, %c0_i32_50 : i32
    scf.if %76 {
      %c0_51 = arith.constant 0 : index
      %c0_52 = arith.constant 0 : index
      %77 = vector.load %arg11[%c0_51, %c0_52] : memref<32x64xf32, #tpu.memory_space<vmem>>, vector<32x64xf32>
      %c0_53 = arith.constant 0 : index
      %c0_54 = arith.constant 0 : index
      %78 = vector.load %arg7[%c0_53, %c0_54] : memref<1x64xf32, #tpu.memory_space<vmem>>, vector<1x64xf32>
      %79 = vector.broadcast %78 : vector<1x64xf32> to vector<32x64xf32>
      %80 = arith.mulf %77, %79 : vector<32x64xf32>
      %c0_55 = arith.constant 0 : index
      %c0_56 = arith.constant 0 : index
      %81 = vector.load %arg8[%c0_55, %c0_56] : memref<1x64xf32, #tpu.memory_space<vmem>>, vector<1x64xf32>
      %82 = vector.broadcast %81 : vector<1x64xf32> to vector<32x64xf32>
      %83 = arith.addf %80, %82 : vector<32x64xf32>
      %cst_57 = arith.constant 0.000000e+00 : f32
      %84 = vector.broadcast %cst_57 : f32 to vector<32x64xf32>
      %85 = arith.maximumf %83, %84 : vector<32x64xf32>
      %86 = vector.shape_cast %85 : vector<32x64xf32> to vector<1x32x64xf32>
      %87 = arith.truncf %86 : vector<1x32x64xf32> to vector<1x32x64xbf16>
      %c0_58 = arith.constant 0 : index
      %c0_59 = arith.constant 0 : index
      %c0_60 = arith.constant 0 : index
      %88 = vector.load %arg9[%c0_58, %c0_59, %c0_60] : memref<1x32x64xbf16, #tpu.memory_space<vmem>>, vector<1x32x64xbf16>
      tpu.vector_store %arg9[%c0_58, %c0_59, %c0_60], %87 {strides = array<i32>} : memref<1x32x64xbf16, #tpu.memory_space<vmem>>, vector<1x32x64xbf16>,
    } else {
    }
    return
  }
  func.func @transform_0(%arg0: i32, %arg1: i32, %arg2: i32) -> (i32, i32, i32, i32) {
    %c0_i32 = arith.constant 0 : i32
    %c0_i32_0 = arith.constant 0 : i32
    return %arg0, %arg1, %c0_i32, %arg2 : i32, i32, i32, i32
  }
  func.func @transform_1(%arg0: i32, %arg1: i32, %arg2: i32) -> (i32, i32, i32, i32) {
    %c4_i32 = arith.constant 4 : i32
    %0 = arith.muli %arg1, %c4_i32 : i32
    %c1_i32 = arith.constant 1 : i32
    %1 = arith.subi %0, %c1_i32 : i32
    %c0_i32 = arith.constant 0 : i32
    %2 = arith.maxsi %1, %c0_i32 : i32
    %c0_i32_0 = arith.constant 0 : i32
    %c0_i32_1 = arith.constant 0 : i32
    return %arg0, %2, %c0_i32_0, %arg2 : i32, i32, i32, i32
  }
  func.func @transform_2(%arg0: i32, %arg1: i32, %arg2: i32) -> (i32, i32, i32, i32) {
    %c1_i32 = arith.constant 1 : i32
    %0 = arith.addi %arg1, %c1_i32 : i32
    %c4_i32 = arith.constant 4 : i32
    %1 = arith.muli %0, %c4_i32 : i32
    %c15_i32 = arith.constant 15 : i32
    %2 = arith.minsi %1, %c15_i32 : i32
    %c0_i32 = arith.constant 0 : i32
    %c0_i32_0 = arith.constant 0 : i32
    return %arg0, %2, %c0_i32, %arg2 : i32, i32, i32, i32
  }
  func.func @transform_3(%arg0: i32, %arg1: i32, %arg2: i32) -> (i32, i32, i32) {
    %c0_i32 = arith.constant 0 : i32
    %c0_i32_0 = arith.constant 0 : i32
    %c0_i32_1 = arith.constant 0 : i32
    return %c0_i32, %arg2, %c0_i32_0 : i32, i32, i32
  }
  func.func @transform_4(%arg0: i32, %arg1: i32, %arg2: i32) -> (i32, i32) {
    %c0_i32 = arith.constant 0 : i32
    %c0_i32_0 = arith.constant 0 : i32
    %c0_i32_1 = arith.constant 0 : i32
    return %c0_i32, %c0_i32_0 : i32, i32
  }
  func.func @transform_5(%arg0: i32, %arg1: i32, %arg2: i32) -> (i32, i32) {
    %c0_i32 = arith.constant 0 : i32
    %c0_i32_0 = arith.constant 0 : i32
    %c0_i32_1 = arith.constant 0 : i32
    return %c0_i32, %c0_i32_0 : i32, i32
  }
  func.func @transform_6(%arg0: i32, %arg1: i32, %arg2: i32) -> (i32, i32, i32) {
    %c0_i32 = arith.constant 0 : i32
    %c0_i32_0 = arith.constant 0 : i32
    return %arg0, %arg1, %c0_i32 : i32, i32, i32
  }
}

</mosaic_0001>

<bundles_post_ra>
// kernel: tpu_custom_call.1
= control target key start
LH: loop header
LB: loop body
LE: loop exit
PB: predicated region body
PF: predicated region fallthrough
CT: control target
= control target key end

     0   :  { %s4190_s0 = inlined_call_operand.vmem [shape: bf16[1,16,8,256], index: 0, kind: input, shape index: {}]   ;;  %s4191_s1 = inlined_call_operand.vmem [shape: bf16[1,16,8,256], index: 1, kind: input, shape index: {}]   ;;  %s4192_s2 = inlined_call_operand.vmem [shape: bf16[1,16,8,256], index: 2, kind: input, shape index: {}]   ;;  %s4193_s3 = inlined_call_operand.vmem [shape: bf16[9,256,64], index: 3, kind: input, shape index: {}]   ;;  %s4194_s4 = inlined_call_operand.vmem [shape: f32[1,64], index: 4, kind: input, shape index: {}]   ;;  %s4195_s5 = inlined_call_operand.vmem [shape: f32[1,64], index: 5, kind: input, shape index: {}]   ;;  %s4196_s6 = inlined_call_operand.vmem [shape: bf16[1,128,64], index: 6, kind: output, shape index: {}]  }
   0x1   :  { %4200 = sst [smem:[#allocation9_spill]] %s4190_s0 }
   0x2   :  { %4201 = sst [smem:[#allocation10_spill]] %s4193_s3 }
   0x3   :  { %s3644_s21 = smov 0   ;;  %s3646_s22 = smov 0  }
   0x4   :  { %s3648_s23 = smov 0   ;;  %s3650_s24 = smov 0  }
   0x5   :  { %s3652_s25 = smov 0   ;;  %s3654_s26 = smov 0  }
   0x6   :  { %s3656_s27 = smov 0   ;;  %s3658_s28 = smov 0  }
   0x7   :  { %s3660_s29 = smov 0  }
   0x8 LB: > { %4202 = sst [smem:[#allocation6_spill]] %s3603_s28  ;;  %s28_s30 = sadd.s32 1, %s3599_s27  ;;  %s3607_s29 = sphi %s3660_s29, %s16_s29   ;;  %s3603_s28 = sphi %s3658_s28, %s4223_s28   ;;  %s3599_s27 = sphi %s3656_s27, %s4229_s27   ;;  %s3595_s26 = sphi %s3654_s26, %s4221_s26   ;;  %s3591_s25 = sphi %s3652_s25, %s4228_s25   ;;  %s3587_s24 = sphi %s3650_s24, %s4227_s24   ;;  %s3583_s23 = sphi %s3648_s23, %s4226_s23   ;;  %s3579_s22 = sphi %s3646_s22, %s4225_s22   ;;  %s3575_s21 = sphi %s3644_s21, %s4224_s21  }
   0x9   : > { %p29_p0 = scmp.ge.s32.totalorder %s28_s30, 2  ;;  %s31_s7 = sadd.s32 1, %s3603_s28 }
   0xa   : > { %p53_p1 = scmp.ne.s32.totalorder %s3587_s24, %s3583_s23  ;;  %p54_p2 = scmp.eq.s32.totalorder %s3607_s29, 0 }
   0xb   : > { %s4231_s30 = smov (%p29_p0, %s28_s30), 0  ;;  %s4233_s7 = smov (!%p29_p0, %s31_s7), %s3603_s28 }
   0xc   : > { %4203 = sst [smem:[#allocation7_spill]] %s4231_s30  ;;  %s42_s8 = ssub.s32 %s3599_s27, %s4231_s30 }
   0xd   : > { %p3699_p3 = por %p54_p2, %p53_p1  ;;  %p33_p4 = scmp.ge.s32.totalorder %s4233_s7, 4 }
   0xe   : > { %p146_p5 = scmp.eq.s32.totalorder %s42_s8, 0  ;;  %s148_s10 = sadd.s32 1, %s3579_s22 }
   0xf   : > { %p155_p6 = scmp.ne.s32.totalorder %s3579_s22, %s3575_s21  ;;  %s4235_s7 = smov (%p33_p4, %s4233_s7), 0 }
  0x10   : > { %4205 = sst [smem:[#allocation8_spill]] %s4235_s7  ;;  %s40_s12 = ssub.s32 %s3603_s28, %s4235_s7 }
  0x11   : > { %s3709_s11 = scalar_select %p146_p5, %s3579_s22, %s148_s10  }
  0x12   : > { %p3713_p7 = por %p155_p6, %p54_p2  ;;  %s43_s14 = sor.u32 %s42_s8, %s40_s12 }
  0x13   : > { %s46_s15 = sadd.s32 1, %s3587_s24  ;;  %p44_p8 = scmp.eq.s32.totalorder %s43_s14, 0 }
  0x14   : > { %p2840_p9 = scmp.ge.s32.totalorder %s3607_s29, 8 }
  0x15   : > { %s3719_s16 = scalar_select %p44_p8, %s3587_s24, %s46_s15  }
  0x16   : > { %257 = sbr.rel (%p2840_p9) target bundleno = 86 (0x56), region = 24 }
  0x1b   : > { %260 = sbr.rel (!%p3699_p3) target bundleno = 39 (0x27), region = 28  ;;  %s262_s17 = sand.u32 (%p3699_p3), 1, %s3587_s24  }
  0x1c   : > { %s3107_s18 = sshll.u32 (%p3699_p3), %s3603_s28, 3  ;;  %s2841_s19 = sshll.u32 (%p3699_p3), %s262_s17, 4 }
  0x1d   : > { %s267_s20 = sadd.s32 (%p3699_p3), %s3599_s27, %s3107_s18  ;;  %s4207_s0 = sld [smem:[#allocation9_spill]] (%p3699_p3) }
  0x1e   : > { %s2844_s10 = sshll.u32 (%p3699_p3), %s267_s20, 2  ;;  %s264_s14 = scalar_lea.vmem (%p3699_p3), [#allocation4], %s2841_s19 }
  0x23   : > { %s271_s12 = scalar_lea.vmem %s4207_s0, %s2844_s10 }
  0x24   : > { %v288_v0 = vld [vmem:[%s271_s12] sm:$0xf]  ;;  %v290_v1 = vld [vmem:[%s271_s12 + $0x8] sm:$0xf]  ;;  %v292_v2 = vld [vmem:[%s271_s12 + $0x10] sm:$0xf] }
  0x25   : > { %289 = vst [vmem:[%s264_s14] sm:$0xf] %v288_v0  ;;  %291 = vst [vmem:[%s264_s14 + $0x4] sm:$0xf] %v290_v1  ;;  %v294_v3 = vld [vmem:[%s271_s12 + $0x18] sm:$0xf] }
  0x26   : > { %293 = vst [vmem:[%s264_s14 + $0x8] sm:$0xf] %v292_v2  ;;  %295 = vst [vmem:[%s264_s14 + $0xc] sm:$0xf] %v294_v3 }
  0x27 PF: > { %373 = sbr.rel (!%p3713_p7) target bundleno = 86 (0x56), region = 77  ;;  %s375_s9 = sand.u32 (%p3713_p7), 1, %s3579_s22  }
  0x28   : > { %s3108_s15 = sshll.u32 (%p3713_p7), %s3599_s27, 6  ;;  %s3387_s17 = smul.u32 (%p3713_p7), 576, %s375_s9 }
  0x29   : > { %s4208_s3 = sld [smem:[#allocation10_spill]] (%p3713_p7) }
  0x2a   : > { %s3745_s13 = scalar_lea.vmem (%p3713_p7), [#allocation5], %s3387_s17 }
  0x2f   : > { %s3737_s20 = scalar_lea.vmem %s4208_s3, %s3108_s15 }
  0x30   : > { %v397_v4 = vld [vmem:[%s3737_s20] sm:$0xff]   ;;  %v401_v5 = vld [vmem:[%s3737_s20 + $0x8] sm:$0xff]   ;;  %v405_v6 = vld [vmem:[%s3737_s20 + $0x10] sm:$0xff]  }
  0x31   : > { %v409_v7 = vld [vmem:[%s3737_s20 + $0x18] sm:$0xff]   ;;  %v413_v8 = vld [vmem:[%s3737_s20 + $0x20] sm:$0xff]   ;;  %v417_v9 = vld [vmem:[%s3737_s20 + $0x28] sm:$0xff]   ;;  %398 = vst [vmem:[%s3745_s13] sm:$0xff] %v397_v4  }
  0x32   : > { %402 = vst [vmem:[%s3745_s13 + $0x8] sm:$0xff] %v401_v5   ;;  %406 = vst [vmem:[%s3745_s13 + $0x10] sm:$0xff] %v405_v6   ;;  %v421_v10 = vld [vmem:[%s3737_s20 + $0x30] sm:$0xff]   ;;  %v425_v11 = vld [vmem:[%s3737_s20 + $0x38] sm:$0xff]  }
  0x33   : > { %410 = vst [vmem:[%s3745_s13 + $0x18] sm:$0xff] %v409_v7   ;;  %414 = vst [vmem:[%s3745_s13 + $0x20] sm:$0xff] %v413_v8   ;;  %v429_v12 = vld [vmem:[%s3737_s20 + $0x80] sm:$0xff]   ;;  %v433_v13 = vld [vmem:[%s3737_s20 + $0x88] sm:$0xff]  }
  0x34   : > { %418 = vst [vmem:[%s3745_s13 + $0x28] sm:$0xff] %v417_v9   ;;  %422 = vst [vmem:[%s3745_s13 + $0x30] sm:$0xff] %v421_v10   ;;  %v437_v14 = vld [vmem:[%s3737_s20 + $0x90] sm:$0xff]   ;;  %v441_v15 = vld [vmem:[%s3737_s20 + $0x98] sm:$0xff]  }
  0x35   : > { %426 = vst [vmem:[%s3745_s13 + $0x38] sm:$0xff] %v425_v11   ;;  %430 = vst [vmem:[%s3745_s13 + $0x40] sm:$0xff] %v429_v12   ;;  %v445_v16 = vld [vmem:[%s3737_s20 + $0xa0] sm:$0xff]   ;;  %v449_v17 = vld [vmem:[%s3737_s20 + $0xa8] sm:$0xff]  }
  0x36   : > { %434 = vst [vmem:[%s3745_s13 + $0x48] sm:$0xff] %v433_v13   ;;  %438 = vst [vmem:[%s3745_s13 + $0x50] sm:$0xff] %v437_v14   ;;  %v453_v18 = vld [vmem:[%s3737_s20 + $0xb0] sm:$0xff]   ;;  %v457_v19 = vld [vmem:[%s3737_s20 + $0xb8] sm:$0xff]  }
  0x37   : > { %442 = vst [vmem:[%s3745_s13 + $0x58] sm:$0xff] %v441_v15   ;;  %446 = vst [vmem:[%s3745_s13 + $0x60] sm:$0xff] %v445_v16   ;;  %v461_v20 = vld [vmem:[%s3737_s20 + $0x100] sm:$0xff]   ;;  %v465_v21 = vld [vmem:[%s3737_s20 + $0x108] sm:$0xff]  }
  0x38   : > { %450 = vst [vmem:[%s3745_s13 + $0x68] sm:$0xff] %v449_v17   ;;  %454 = vst [vmem:[%s3745_s13 + $0x70] sm:$0xff] %v453_v18   ;;  %v469_v22 = vld [vmem:[%s3737_s20 + $0x110] sm:$0xff]   ;;  %v473_v23 = vld [vmem:[%s3737_s20 + $0x118] sm:$0xff]  }
  0x39   : > { %458 = vst [vmem:[%s3745_s13 + $0x78] sm:$0xff] %v457_v19   ;;  %462 = vst [vmem:[%s3745_s13 + $0x80] sm:$0xff] %v461_v20   ;;  %v477_v24 = vld [vmem:[%s3737_s20 + $0x120] sm:$0xff]   ;;  %v481_v25 = vld [vmem:[%s3737_s20 + $0x128] sm:$0xff]  }
  0x3a   : > { %466 = vst [vmem:[%s3745_s13 + $0x88] sm:$0xff] %v465_v21   ;;  %470 = vst [vmem:[%s3745_s13 + $0x90] sm:$0xff] %v469_v22   ;;  %v485_v26 = vld [vmem:[%s3737_s20 + $0x130] sm:$0xff]   ;;  %v489_v27 = vld [vmem:[%s3737_s20 + $0x138] sm:$0xff]  }
  0x3b   : > { %474 = vst [vmem:[%s3745_s13 + $0x98] sm:$0xff] %v473_v23   ;;  %478 = vst [vmem:[%s3745_s13 + $0xa0] sm:$0xff] %v477_v24   ;;  %v493_v28 = vld [vmem:[%s3737_s20 + $0x180] sm:$0xff]   ;;  %v497_v29 = vld [vmem:[%s3737_s20 + $0x188] sm:$0xff]  }
  0x3c   : > { %482 = vst [vmem:[%s3745_s13 + $0xa8] sm:$0xff] %v481_v25   ;;  %486 = vst [vmem:[%s3745_s13 + $0xb0] sm:$0xff] %v485_v26   ;;  %v501_v30 = vld [vmem:[%s3737_s20 + $0x190] sm:$0xff]   ;;  %v505_v31 = vld [vmem:[%s3737_s20 + $0x198] sm:$0xff]  }
  0x3d   : > { %490 = vst [vmem:[%s3745_s13 + $0xb8] sm:$0xff] %v489_v27   ;;  %494 = vst [vmem:[%s3745_s13 + $0xc0] sm:$0xff] %v493_v28   ;;  %v509_v32 = vld [vmem:[%s3737_s20 + $0x1a0] sm:$0xff]   ;;  %v513_v33 = vld [vmem:[%s3737_s20 + $0x1a8] sm:$0xff]  }
  0x3e   : > { %498 = vst [vmem:[%s3745_s13 + $0xc8] sm:$0xff] %v497_v29   ;;  %502 = vst [vmem:[%s3745_s13 + $0xd0] sm:$0xff] %v501_v30   ;;  %v517_v34 = vld [vmem:[%s3737_s20 + $0x1b0] sm:$0xff]   ;;  %v521_v35 = vld [vmem:[%s3737_s20 + $0x1b8] sm:$0xff]  }
  0x3f   : > { %506 = vst [vmem:[%s3745_s13 + $0xd8] sm:$0xff] %v505_v31   ;;  %510 = vst [vmem:[%s3745_s13 + $0xe0] sm:$0xff] %v509_v32   ;;  %v525_v36 = vld [vmem:[%s3737_s20 + $0x200] sm:$0xff]   ;;  %v529_v37 = vld [vmem:[%s3737_s20 + $0x208] sm:$0xff]  }
  0x40   : > { %514 = vst [vmem:[%s3745_s13 + $0xe8] sm:$0xff] %v513_v33   ;;  %518 = vst [vmem:[%s3745_s13 + $0xf0] sm:$0xff] %v517_v34   ;;  %v533_v38 = vld [vmem:[%s3737_s20 + $0x210] sm:$0xff]   ;;  %v537_v39 = vld [vmem:[%s3737_s20 + $0x218] sm:$0xff]  }
  0x41   : > { %522 = vst [vmem:[%s3745_s13 + $0xf8] sm:$0xff] %v521_v35   ;;  %526 = vst [vmem:[%s3745_s13 + $0x100] sm:$0xff] %v525_v36   ;;  %v541_v40 = vld [vmem:[%s3737_s20 + $0x220] sm:$0xff]   ;;  %v545_v41 = vld [vmem:[%s3737_s20 + $0x228] sm:$0xff]  }
  0x42   : > { %530 = vst [vmem:[%s3745_s13 + $0x108] sm:$0xff] %v529_v37   ;;  %534 = vst [vmem:[%s3745_s13 + $0x110] sm:$0xff] %v533_v38   ;;  %v549_v42 = vld [vmem:[%s3737_s20 + $0x230] sm:$0xff]   ;;  %v553_v43 = vld [vmem:[%s3737_s20 + $0x238] sm:$0xff]  }
  0x43   : > { %538 = vst [vmem:[%s3745_s13 + $0x118] sm:$0xff] %v537_v39   ;;  %542 = vst [vmem:[%s3745_s13 + $0x120] sm:$0xff] %v541_v40   ;;  %v557_v44 = vld [vmem:[%s3737_s20 + $0x280] sm:$0xff]   ;;  %v561_v45 = vld [vmem:[%s3737_s20 + $0x288] sm:$0xff]  }
  0x44   : > { %546 = vst [vmem:[%s3745_s13 + $0x128] sm:$0xff] %v545_v41   ;;  %550 = vst [vmem:[%s3745_s13 + $0x130] sm:$0xff] %v549_v42   ;;  %v565_v46 = vld [vmem:[%s3737_s20 + $0x290] sm:$0xff]   ;;  %v569_v47 = vld [vmem:[%s3737_s20 + $0x298] sm:$0xff]  }
  0x45   : > { %554 = vst [vmem:[%s3745_s13 + $0x138] sm:$0xff] %v553_v43   ;;  %558 = vst [vmem:[%s3745_s13 + $0x140] sm:$0xff] %v557_v44   ;;  %v573_v48 = vld [vmem:[%s3737_s20 + $0x2a0] sm:$0xff]   ;;  %v577_v49 = vld [vmem:[%s3737_s20 + $0x2a8] sm:$0xff]  }
  0x46   : > { %562 = vst [vmem:[%s3745_s13 + $0x148] sm:$0xff] %v561_v45   ;;  %566 = vst [vmem:[%s3745_s13 + $0x150] sm:$0xff] %v565_v46   ;;  %v581_v50 = vld [vmem:[%s3737_s20 + $0x2b0] sm:$0xff]   ;;  %v585_v51 = vld [vmem:[%s3737_s20 + $0x2b8] sm:$0xff]  }
  0x47   : > { %570 = vst [vmem:[%s3745_s13 + $0x158] sm:$0xff] %v569_v47   ;;  %574 = vst [vmem:[%s3745_s13 + $0x160] sm:$0xff] %v573_v48   ;;  %v589_v52 = vld [vmem:[%s3737_s20 + $0x300] sm:$0xff]   ;;  %v593_v53 = vld [vmem:[%s3737_s20 + $0x308] sm:$0xff]  }
  0x48   : > { %578 = vst [vmem:[%s3745_s13 + $0x168] sm:$0xff] %v577_v49   ;;  %582 = vst [vmem:[%s3745_s13 + $0x170] sm:$0xff] %v581_v50   ;;  %v597_v54 = vld [vmem:[%s3737_s20 + $0x310] sm:$0xff]   ;;  %v601_v55 = vld [vmem:[%s3737_s20 + $0x318] sm:$0xff]  }
  0x49   : > { %586 = vst [vmem:[%s3745_s13 + $0x178] sm:$0xff] %v585_v51   ;;  %590 = vst [vmem:[%s3745_s13 + $0x180] sm:$0xff] %v589_v52   ;;  %v605_v56 = vld [vmem:[%s3737_s20 + $0x320] sm:$0xff]   ;;  %v609_v57 = vld [vmem:[%s3737_s20 + $0x328] sm:$0xff]  }
  0x4a   : > { %594 = vst [vmem:[%s3745_s13 + $0x188] sm:$0xff] %v593_v53   ;;  %598 = vst [vmem:[%s3745_s13 + $0x190] sm:$0xff] %v597_v54   ;;  %v613_v58 = vld [vmem:[%s3737_s20 + $0x330] sm:$0xff]   ;;  %v617_v59 = vld [vmem:[%s3737_s20 + $0x338] sm:$0xff]  }
  0x4b   : > { %602 = vst [vmem:[%s3745_s13 + $0x198] sm:$0xff] %v601_v55   ;;  %606 = vst [vmem:[%s3745_s13 + $0x1a0] sm:$0xff] %v605_v56   ;;  %v621_v60 = vld [vmem:[%s3737_s20 + $0x380] sm:$0xff]   ;;  %v625_v61 = vld [vmem:[%s3737_s20 + $0x388] sm:$0xff]  }
  0x4c   : > { %610 = vst [vmem:[%s3745_s13 + $0x1a8] sm:$0xff] %v609_v57   ;;  %614 = vst [vmem:[%s3745_s13 + $0x1b0] sm:$0xff] %v613_v58   ;;  %v629_v62 = vld [vmem:[%s3737_s20 + $0x390] sm:$0xff]   ;;  %v633_v63 = vld [vmem:[%s3737_s20 + $0x398] sm:$0xff]  }
  0x4d   : > { %618 = vst [vmem:[%s3745_s13 + $0x1b8] sm:$0xff] %v617_v59   ;;  %622 = vst [vmem:[%s3745_s13 + $0x1c0] sm:$0xff] %v621_v60   ;;  %v637_v0 = vld [vmem:[%s3737_s20 + $0x3a0] sm:$0xff]   ;;  %v641_v1 = vld [vmem:[%s3737_s20 + $0x3a8] sm:$0xff]  }
  0x4e   : > { %626 = vst [vmem:[%s3745_s13 + $0x1c8] sm:$0xff] %v625_v61   ;;  %630 = vst [vmem:[%s3745_s13 + $0x1d0] sm:$0xff] %v629_v62   ;;  %v645_v2 = vld [vmem:[%s3737_s20 + $0x3b0] sm:$0xff]   ;;  %v649_v3 = vld [vmem:[%s3737_s20 + $0x3b8] sm:$0xff]  }
  0x4f   : > { %634 = vst [vmem:[%s3745_s13 + $0x1d8] sm:$0xff] %v633_v63   ;;  %638 = vst [vmem:[%s3745_s13 + $0x1e0] sm:$0xff] %v637_v0   ;;  %v653_v4 = vld [vmem:[%s3737_s20 + $0x400] sm:$0xff]   ;;  %v657_v5 = vld [vmem:[%s3737_s20 + $0x408] sm:$0xff]  }
  0x50   : > { %642 = vst [vmem:[%s3745_s13 + $0x1e8] sm:$0xff] %v641_v1   ;;  %646 = vst [vmem:[%s3745_s13 + $0x1f0] sm:$0xff] %v645_v2   ;;  %v661_v6 = vld [vmem:[%s3737_s20 + $0x410] sm:$0xff]   ;;  %v665_v7 = vld [vmem:[%s3737_s20 + $0x418] sm:$0xff]  }
  0x51   : > { %650 = vst [vmem:[%s3745_s13 + $0x1f8] sm:$0xff] %v649_v3   ;;  %654 = vst [vmem:[%s3745_s13 + $0x200] sm:$0xff] %v653_v4   ;;  %v669_v8 = vld [vmem:[%s3737_s20 + $0x420] sm:$0xff]   ;;  %v673_v9 = vld [vmem:[%s3737_s20 + $0x428] sm:$0xff]  }
  0x52   : > { %658 = vst [vmem:[%s3745_s13 + $0x208] sm:$0xff] %v657_v5   ;;  %662 = vst [vmem:[%s3745_s13 + $0x210] sm:$0xff] %v661_v6   ;;  %v677_v10 = vld [vmem:[%s3737_s20 + $0x430] sm:$0xff]   ;;  %v681_v11 = vld [vmem:[%s3737_s20 + $0x438] sm:$0xff]  }
  0x53   : > { %666 = vst [vmem:[%s3745_s13 + $0x218] sm:$0xff] %v665_v7   ;;  %670 = vst [vmem:[%s3745_s13 + $0x220] sm:$0xff] %v669_v8  }
  0x54   : > { %674 = vst [vmem:[%s3745_s13 + $0x228] sm:$0xff] %v673_v9   ;;  %678 = vst [vmem:[%s3745_s13 + $0x230] sm:$0xff] %v677_v10  }
  0x55   : > { %682 = vst [vmem:[%s3745_s13 + $0x238] sm:$0xff] %v681_v11  }
  0x56 PF: > { %p2847_p10 = scmp.ge.s32.totalorder %s3607_s29, 1  ;;  %p995_p11 = scmp.lt.s32.totalorder %s3607_s29, 9 }
  0x58   : > { %p996_p12 = pnand %p2847_p10, %p995_p11 }
  0x59   : > { %s1002_s19 = sand.u32 (!%p996_p12), 1, %s3583_s23   ;;  %s1009_s10 = sand.u32 (!%p996_p12), 1, %s3575_s21  }
  0x5a   : > { %999 = sbr.rel (%p996_p12) target bundleno = 569 (0x239), region = 118  ;;  %s2848_s8 = sshll.u32 (!%p996_p12), %s1002_s19, 4 }
  0x5b   : > { %s3388_s12 = smul.u32 (!%p996_p12), 576, %s1009_s10  ;;  %s2849_s14 = sshll.u32 (!%p996_p12), %s3595_s26, 2 }
  0x5c   : > { %s2850_s9 = sadd.s32 (!%p996_p12), 4294967295, %s2849_s14  ;;  %p1087_p1 = scmp.lt.s32.totalorder (!%p996_p12), %s3591_s25, 1 }
  0x5d   : > { %p1081_p13 = scmp.gt.s32.totalorder (!%p996_p12), %s2850_s9, 0  ;;  %p2851_p0 = scmp.lt.s32.totalorder (!%p996_p12), %s2850_s9, 15 }
  0x5e   : > { %s3112_s15 = sadd.s32 (!%p996_p12), 4, %s2849_s14  ;;  %p1123_p3 = scmp.lt.s32.totalorder (!%p996_p12), %s2849_s14, 15 }
  0x5f   : > { %s4237_s9 = smov (!%p1081_p13, %s2850_s9), 0  ;;  %p1101_p2 = scmp.lt.s32.totalorder %s3112_s15, 15 }
  0x60   : > { %s1088_s17 = scalar_select %p1087_p1, %s3591_s25, 1 }
  0x61   : > { %s4239_s9 = smov (!%p2851_p0, %s4237_s9), 15  ;;  %s4241_s15 = smov (!%p1101_p2, %s3112_s15), 15 }
  0x62   : > { %s2856_s7 = sshll.u32 %s4239_s9, 1  ;;  %s4243_s14 = smov (!%p1123_p3, %s2849_s14), 15 }
  0x63   : > { %s1090_s18 = sadd.s32 %s2856_s7, %s1088_s17  ;;  %s4245_s15 = smov (!%p1101_p2, %s4241_s15), 15 }
  0x64   : > { %s2857_s20 = sshll.u32 %s1090_s18, 2  ;;  %s2865_s23 = sshll.u32 %s4243_s14, 2 }
  0x65   : > { %s3895_s21 = scalar_lea.vmem %s4191_s1, %s2857_s20  ;;  %s2862_s19 = sshll.u32 %s4245_s15, 1 }
  0x66   : > { %s3900_s30 = scalar_lea.vmem %s4196_s6, %s2865_s23  ;;  %s1110_s9 = sadd.s32 %s2862_s19, %s1088_s17 }
  0x67   : > { %s3902_s28 = sshll.u32 %s1110_s9, 2  ;;  %s3908_s20 = scalar_lea.vmem [#allocation4], %s2848_s8 }
  0x68   : > { %s1114_s0 = scalar_lea.vmem %s4192_s2, %s3902_s28  ;;  %s3910_s13 = scalar_lea.vmem [#allocation5], %s3388_s12 }
  0x69   : > { %p2866_p4 = scmp.ne.s32.totalorder %s3591_s25, 0 }
  0x6a   : > { %p2867_p5 = scmp.ne.s32.totalorder (!%p2866_p4), %s3595_s26, 0 }
  0x6b   : > { %1134 = sbr.rel (%p2866_p4) target bundleno = 142 (0x8e), region = 130 }
  0x70   : > { %vm1135_vm0 = vcmask 1040384   ;;  %vm1136_vm1 = vsmask.f32 256  ;;  %v1138_v12 = vld [vmem:[#allocation2] sm:$0x1] }
  0x71   : > { %vm3915_vm2 = vmand %vm1135_vm0, %vm1136_vm1  ;;  %v1141_v14 = vld [vmem:[#allocation2 + $0x8] sm:$0x1]  ;;  %v1144_v15 = vld [vmem:[#allocation2 + $0x10] sm:$0x1]  ;;  %vm1156_vm3 = vsmask.f32 7938 }
  0x72   : > { %v1139_v16 = vsel %vm3915_vm2, 0, %v1138_v12  ;;  %v1142_v17 = vsel %vm3915_vm2, 0, %v1141_v14  ;;  %v1145_v18 = vsel %vm3915_vm2, 0, %v1144_v15  ;;  %v1147_v19 = vld [vmem:[#allocation2 + $0x18] sm:$0x1]  ;;  %vm3926_vm4 = vmand %vm1135_vm0, %vm1156_vm3 }
  0x73   : > { %1140 = vst [vmem:[#allocation2] sm:$0x1] %v1139_v16  ;;  %1143 = vst [vmem:[#allocation2 + $0x8] sm:$0x1] %v1142_v17  ;;  %v1148_v21 = vsel %vm3915_vm2, 0, %v1147_v19 }
  0x74   : > { %1146 = vst [vmem:[#allocation2 + $0x10] sm:$0x1] %v1145_v18  ;;  %v1150_v22 = vld [vmem:[#allocation2 + $0x20] sm:$0x1]  ;;  %v1153_v23 = vld [vmem:[#allocation2 + $0x28] sm:$0x1] }
  0x75   : > { %1149 = vst [vmem:[#allocation2 + $0x18] sm:$0x1] %v1148_v21  ;;  %v1151_v24 = vsel %vm3915_vm2, 0, %v1150_v22  ;;  %v1154_v25 = vsel %vm3915_vm2, 0, %v1153_v23  ;;  %v1158_v26 = vld [vmem:[#allocation2 + $0x4] sm:$0x1] }
  0x76   : > { %v1161_v27 = vld [vmem:[#allocation2 + $0xc] sm:$0x1]  ;;  %1152 = vst [vmem:[#allocation2 + $0x20] sm:$0x1] %v1151_v24  ;;  %1155 = vst [vmem:[#allocation2 + $0x28] sm:$0x1] %v1154_v25 }
  0x77   : > { %v1159_v28 = vsel %vm3926_vm4, 0, %v1158_v26  ;;  %v1162_v29 = vsel %vm3926_vm4, 0, %v1161_v27  ;;  %v1164_v30 = vld [vmem:[#allocation2 + $0x14] sm:$0x1]  ;;  %v1167_v31 = vld [vmem:[#allocation2 + $0x1c] sm:$0x1] }
  0x78   : > { %1160 = vst [vmem:[#allocation2 + $0x4] sm:$0x1] %v1159_v28  ;;  %1163 = vst [vmem:[#allocation2 + $0xc] sm:$0x1] %v1162_v29  ;;  %v1165_v32 = vsel %vm3926_vm4, 0, %v1164_v30  ;;  %v1168_v33 = vsel %vm3926_vm4, 0, %v1167_v31 }
  0x79   : > { %v1170_v34 = vld [vmem:[#allocation2 + $0x24] sm:$0x1]  ;;  %v1173_v35 = vld [vmem:[#allocation2 + $0x2c] sm:$0x1]  ;;  %1166 = vst [vmem:[#allocation2 + $0x14] sm:$0x1] %v1165_v32 }
  0x7a   : > { %1169 = vst [vmem:[#allocation2 + $0x1c] sm:$0x1] %v1168_v33  ;;  %v1171_v36 = vsel %vm3926_vm4, 0, %v1170_v34  ;;  %v1174_v37 = vsel %vm3926_vm4, 0, %v1173_v35  ;;  %1179 = sbr.rel (%p2867_p5) target bundleno = 131 (0x83), region = 134 }
  0x7b   : > { %1172 = vst [vmem:[#allocation2 + $0x24] sm:$0x1] %v1171_v36  ;;  %1175 = vst [vmem:[#allocation2 + $0x2c] sm:$0x1] %v1174_v37 }
  0x7f   : > { %vm1180_vm5 = vcmask 1043456   ;;  %v1182_v38 = vld [vmem:[#allocation2] sm:$0xf]  ;;  %v1185_v39 = vld [vmem:[#allocation2 + $0x4] sm:$0x1] }
  0x80   : > { %vm1181_vm6 = vmand %vm1180_vm5, %vm1156_vm3  ;;  %v1186_v40 = vsel %vm3915_vm2, 0, %v1185_v39 }
  0x81   : > { %v1183_v41 = vsel %vm1181_vm6, 0, %v1182_v38  ;;  %1187 = vst [vmem:[#allocation2 + $0x4] sm:$0x1] %v1186_v40 }
  0x82   : > { %1184 = vst [vmem:[#allocation2] sm:$0xf] %v1183_v41 }
  0x83 PF: > { %p2868_p6 = scmp.ne.s32.totalorder %s3595_s26, 3 }
  0x85   : > { %1191 = sbr.rel (%p2868_p6) target bundleno = 142 (0x8e), region = 138 }
  0x8a   : > { %vm1193_vm7 = vcmask 1043456   ;;  %v1195_v42 = vld [vmem:[#allocation2 + $0x28] sm:$0xf]  ;;  %v1198_v43 = vld [vmem:[#allocation2 + $0x2c] sm:$0x1] }
  0x8b   : > { %vm1194_vm8 = vmand %vm1193_vm7, %vm1156_vm3  ;;  %v1199_v44 = vsel %vm3915_vm2, 0, %v1198_v43 }
  0x8c   : > { %v1196_v45 = vsel %vm1194_vm8, 0, %v1195_v42  ;;  %1200 = vst [vmem:[#allocation2 + $0x2c] sm:$0x1] %v1199_v44 }
  0x8d   : > { %1197 = vst [vmem:[#allocation2 + $0x28] sm:$0xf] %v1196_v45 }
  0x8e PF: > { %p2869_p7 = scmp.le.s32.totalorder %s3595_s26, 0 }
  0x90   : > { %1204 = sbr.rel (%p2869_p7) target bundleno = 158 (0x9e), region = 142 }
  0x95   : > { %v1205_v46 = vld [vmem:[%s3895_s21] sm:$0xf]  ;;  %vm1216_vm9 = vcmask 1043456   ;;  %vm1217_vm10 = vsmask.f32 7938  ;;  %vm1222_vm11 = vcmask 1040384  }
  0x96   : > { %v1207_v47 = vshrl.u32 %v1205_v46, 16  ;;  %v1210_v48 = vshll.u32 %v1205_v46, 16  ;;  %vm1223_vm12 = vsmask.f32 256  ;;  %vm1218_vm13 = vmand %vm1216_vm9, %vm1217_vm10  ;;  %v1219_v50 = vld [vmem:[#allocation2] sm:$0xf] }
  0x97   : > { %vm1224_vm14 = vmand %vm1222_vm11, %vm1223_vm12  ;;  %v1225_v51 = vld [vmem:[#allocation2 + $0x4] sm:$0x1] }
  0x98   : > { %v1209_v49 = vrot.slane %v1207_v47, 7 }
  0x9a   : > { %v1212_v52 = vor.u32 %v1210_v48, %v1209_v49  ;;  %v1213_v53 = vrot.slane %v1209_v49, 4 }
  0x9c   : > { %v1220_v54 = vsel %vm1218_vm13, %v1212_v52, %v1219_v50  ;;  %v1226_v55 = vsel %vm1224_vm14, %v1213_v53, %v1225_v51 }
  0x9d   : > { %1221 = vst [vmem:[#allocation2] sm:$0xf] %v1220_v54  ;;  %1227 = vst [vmem:[#allocation2 + $0x4] sm:$0x1] %v1226_v55 }
  0x9e PF: > { %p2870_p8 = scmp.ge.s32.totalorder %s3595_s26, 3 }
  0xa0   : > { %1231 = sbr.rel (%p2870_p8) target bundleno = 174 (0xae), region = 146 }
  0xa5   : > { %v1232_v56 = vld [vmem:[%s1114_s0] sm:$0xf]  ;;  %vm1244_vm15 = vcmask 1043456   ;;  %vm1245_vm0 = vsmask.f32 7938  ;;  %vm1250_vm1 = vcmask 1040384  }
  0xa6   : > { %v1234_v57 = vshrl.u32 %v1232_v56, 16  ;;  %v1237_v58 = vshll.u32 %v1232_v56, 16  ;;  %vm1251_vm2 = vsmask.f32 256  ;;  %vm1246_vm3 = vmand %vm1244_vm15, %vm1245_vm0  ;;  %v1247_v60 = vld [vmem:[#allocation2 + $0x28] sm:$0xf] }
  0xa7   : > { %vm1252_vm4 = vmand %vm1250_vm1, %vm1251_vm2  ;;  %v1253_v61 = vld [vmem:[#allocation2 + $0x2c] sm:$0x1] }
  0xa8   : > { %v1236_v59 = vrot.slane %v1234_v57, 7 }
  0xaa   : > { %v1239_v62 = vor.u32 %v1237_v58, %v1236_v59  ;;  %v1240_v63 = vrot.slane %v1236_v59, 4 }
  0xac   : > { %v1248_v0 = vsel %vm1246_vm3, %v1239_v62, %v1247_v60  ;;  %v1254_v1 = vsel %vm1252_vm4, %v1240_v63, %v1253_v61 }
  0xad   : > { %1249 = vst [vmem:[#allocation2 + $0x28] sm:$0xf] %v1248_v0  ;;  %1255 = vst [vmem:[#allocation2 + $0x2c] sm:$0x1] %v1254_v1 }
  0xae PF: > { %v3461_v2 = vld [vmem:[%s3910_s13 + $0xf8] sm:$0xff]   ;;  %v3463_v4 = vld [vmem:[%s3910_s13 + $0xf0] sm:$0xff]   ;;  %v3465_v6 = vld [vmem:[%s3910_s13 + $0xe8] sm:$0xff]   ;;  %vm1301_vm5 = vcmask 1043456   ;;  %vm1307_vm6 = vcmask 1040384   ;;  %vm2187_vm14 = vcmask 1042432  }
  0xaf   : > { %v3462_v3 = vld [vmem:[%s3910_s13 + $0x38] sm:$0xff]   ;;  %3207 = vmatprep.subr.bf16.mxu0 %v3461_v2  ;;  %v3464_v5 = vld [vmem:[%s3910_s13 + $0x30] sm:$0xff]   ;;  %v3466_v7 = vld [vmem:[%s3910_s13 + $0x28] sm:$0xff]   ;;  %vm1302_vm7 = vsmask.f32 7938  ;;  %vm2188_vm15 = vcmask 1046532  }
  0xb0   : > { %3227 = vmatprep.subr.bf16.mxu1 %v3462_v3  ;;  %3208 = vmatpush3.bf16.msra.mxu0 %v3461_v2  ;;  %v3467_v8 = vld [vmem:[%s3910_s13 + $0xe0] sm:$0xff]   ;;  %v3469_v10 = vld [vmem:[%s3910_s13 + $0xd8] sm:$0xff]   ;;  %v3471_v12 = vld [vmem:[%s3910_s13 + $0xd0] sm:$0xff]   ;;  %vm1308_vm8 = vsmask.f32 256 }
  0xb1   : > { %3228 = vmatpush3.bf16.msra.mxu1 %v3462_v3  ;;  %3209 = vmatprep.subr.bf16.mxu0 %v3463_v4  ;;  %v3468_v9 = vld [vmem:[%s3910_s13 + $0x20] sm:$0xff]   ;;  %v3470_v11 = vld [vmem:[%s3910_s13 + $0x18] sm:$0xff]   ;;  %v3472_v16 = vld [vmem:[%s3910_s13 + $0x10] sm:$0xff]   ;;  %vm1716_vm11 = vsmask.f32 3328 }
  0xb2   : > { %3229 = vmatprep.subr.bf16.mxu1 %v3464_v5  ;;  %v1256_v13 = vld [vmem:[%s3908_s20] sm:$0xf]  ;;  %v1257_v14 = vld [vmem:[%s3908_s20 + $0x4] sm:$0xf]  ;;  %v1258_v15 = vld [vmem:[%s3908_s20 + $0x8] sm:$0xf] }
  0xb3   : > { %v1261_v17 = vshrl.u32 %v1256_v13, 16  ;;  %v1264_v18 = vshll.u32 %v1256_v13, 16  ;;  %v1269_v19 = vshrl.u32 %v1257_v14, 16  ;;  %v1272_v20 = vshll.u32 %v1257_v14, 16  ;;  %v3473_v23 = vld [vmem:[%s3910_s13 + $0xc8] sm:$0xff]   ;;  %vm3983_vm9 = vmand %vm1301_vm5, %vm1302_vm7  ;;  %v3475_v38 = vld [vmem:[%s3910_s13 + $0xc0] sm:$0xff]  }
  0xb4   : > { %3210 = vmatpush3.bf16.msra.mxu0 %v3463_v4  ;;  %v1277_v21 = vshrl.u32 %v1258_v15, 16  ;;  %v1280_v22 = vshll.u32 %v1258_v15, 16  ;;  %v1304_v27 = vld [vmem:[#allocation2 + $0x8] sm:$0xf]  ;;  %vm3990_vm10 = vmand %vm1307_vm6, %vm1308_vm8  ;;  %v1313_v30 = vld [vmem:[#allocation2 + $0x10] sm:$0xf] }
  0xb5   : > { %3230 = vmatpush3.bf16.msra.mxu1 %v3464_v5  ;;  %3211 = vmatprep.subr.bf16.mxu0 %v3465_v6  ;;  %v3980_v24 = vrot.slane %v1261_v17, 7  ;;  %v1271_v25 = vrot.slane %v1269_v19, 7  ;;  %v1316_v31 = vld [vmem:[#allocation2 + $0x14] sm:$0x1]  ;;  %v3474_v32 = vld [vmem:[%s3910_s13 + $0x8] sm:$0xff]   ;;  %v3481_v52 = vld [vmem:[%s3910_s13 + $0x1b8] sm:$0xff]  }
  0xb6   : > { %3231 = vmatprep.subr.bf16.mxu1 %v3466_v7  ;;  %v3987_v28 = vrot.slane %v1277_v21, 7  ;;  %v1319_v36 = vld [vmem:[#allocation2 + $0x18] sm:$0xf]  ;;  %v1259_v37 = vld [vmem:[%s3908_s20 + $0xc] sm:$0xf]  ;;  %v3476_v45 = vld [vmem:[%s3910_s13] sm:$0xff]  }
  0xb7   : > { %v1266_v33 = vor.u32 %v1264_v18, %v3980_v24  ;;  %v1274_v34 = vor.u32 %v1272_v20, %v1271_v25  ;;  %v1275_v35 = vrot.slane %v1271_v25, 4  ;;  %v1285_v40 = vshrl.u32 %v1259_v37, 16  ;;  %v1325_v48 = vld [vmem:[#allocation2 + $0x20] sm:$0xf]  ;;  %v3482_v53 = vld [vmem:[%s3910_s13 + $0x78] sm:$0xff]   ;;  %v3486_v0 = vld [vmem:[%s3910_s13 + $0x68] sm:$0xff]  }
  0xb8   : > { %3212 = vmatpush3.bf16.msra.mxu0 %v3465_v6  ;;  %v1282_v39 = vor.u32 %v1280_v22, %v3987_v28  ;;  %v1288_v41 = vshll.u32 %v1259_v37, 16  ;;  %v1331_v50 = vld [vmem:[#allocation2] sm:$0xf]  ;;  %v1267_v1 = vrot.slane %v3980_v24, 4  ;;  %v3485_v2 = vld [vmem:[%s3910_s13 + $0x1a8] sm:$0xff]   ;;  %v1283_v3 = vrot.slane %v3987_v28, 4  ;;  %vm4094_vm0 = vmor %vm2187_vm14, %vm2188_vm15 }
  0xb9   : > { %3232 = vmatpush3.bf16.msra.mxu1 %v3466_v7  ;;  %3213 = vmatprep.subr.bf16.mxu0 %v3467_v8  ;;  %v1305_v42 = vsel %vm3983_vm9, %v1266_v33, %v1304_v27  ;;  %v1314_v43 = vsel %vm3983_vm9, %v1274_v34, %v1313_v30  ;;  %v1317_v44 = vsel %vm3990_vm10, %v1275_v35, %v1316_v31  ;;  %v4008_v47 = vrot.slane %v1285_v40, 7  ;;  %v3484_v60 = vld [vmem:[%s3910_s13 + $0x70] sm:$0xff]   ;;  %v3488_v4 = vld [vmem:[%s3910_s13 + $0x60] sm:$0xff]   ;;  %v1310_v5 = vld [vmem:[#allocation2 + $0xc] sm:$0x1] }
  0xba   : > { %3233 = vmatprep.subr.bf16.mxu1 %v3468_v9  ;;  %1306 = vst [vmem:[#allocation2 + $0x8] sm:$0xf] %v1305_v42  ;;  %1315 = vst [vmem:[#allocation2 + $0x10] sm:$0xf] %v1314_v43  ;;  %v1320_v46 = vsel %vm3983_vm9, %v1282_v39, %v1319_v36  ;;  %v3483_v62 = vld [vmem:[%s3910_s13 + $0x1b0] sm:$0xff]   ;;  %v3490_v15 = vld [vmem:[%s3910_s13 + $0x58] sm:$0xff]  }
  0xbb   : > { %1318 = vst [vmem:[#allocation2 + $0x14] sm:$0x1] %v1317_v44  ;;  %1321 = vst [vmem:[#allocation2 + $0x18] sm:$0xf] %v1320_v46  ;;  %v1290_v49 = vor.u32 %v1288_v41, %v4008_v47  ;;  %v1704_v6 = vld [vmem:[#allocation2] sm:$0xf] }
  0xbc   : > { %3214 = vmatpush3.bf16.msra.mxu0 %v3467_v8  ;;  %v4025_v7 = vld [vmem:[#allocation2 + $0x4] sm:$0x1]  ;;  %v1311_v8 = vsel %vm3990_vm10, %v1267_v1, %v1310_v5  ;;  %vm1717_vm12 = vsmask.f32 7440  ;;  %v1322_v14 = vld [vmem:[#allocation2 + $0x1c] sm:$0x1] }
  0xbd   : > { %3234 = vmatpush3.bf16.msra.mxu1 %v3468_v9  ;;  %3215 = vmatprep.subr.bf16.mxu0 %v3469_v10  ;;  %v1326_v51 = vsel %vm3983_vm9, %v1290_v49, %v1325_v48  ;;  %1312 = vst [vmem:[#allocation2 + $0xc] sm:$0x1] %v1311_v8  ;;  %v1323_v17 = vsel %vm3990_vm10, %v1283_v3, %v1322_v14  ;;  %v1729_v22 = vshll.u32 %v4025_v7, 16  ;;  %v3489_v28 = vld [vmem:[%s3910_s13 + $0x198] sm:$0xff]   ;;  %v3492_v33 = vld [vmem:[%s3910_s13 + $0x50] sm:$0xff]   ;;  %vm4043_vm13 = vmor %vm1716_vm11, %vm1717_vm12 }
  0xbe   : > { %3235 = vmatprep.subr.bf16.mxu1 %v3470_v11  ;;  %1327 = vst [vmem:[#allocation2 + $0x20] sm:$0xf] %v1326_v51  ;;  %1324 = vst [vmem:[#allocation2 + $0x1c] sm:$0x1] %v1323_v17  ;;  %v3491_v49 = vld [vmem:[%s3910_s13 + $0x190] sm:$0xff]   ;;  %v3495_v1 = vld [vmem:[%s3910_s13 + $0x180] sm:$0xff]  }
  0xbf   : > { %v1731_v39 = vrot.slane %v1729_v22, 5  ;;  %v3501_v29 = vld [vmem:[%s3910_s13 + $0x128] sm:$0xff]   ;;  %v3503_v17 = vld [vmem:[%s3910_s13 + $0x120] sm:$0xff]   ;;  %v3516_v43 = vld [vmem:[%s3910_s13 + $0x170] sm:$0xff]  }
  0xc0   : > { %3216 = vmatpush3.bf16.msra.mxu0 %v3469_v10  ;;  %v3487_v10 = vld [vmem:[%s3910_s13 + $0x1a0] sm:$0xff]  }
  0xc1   : > { %3236 = vmatpush3.bf16.msra.mxu1 %v3470_v11  ;;  %3217 = vmatprep.subr.bf16.mxu0 %v3471_v12  ;;  %v1332_v54 = vld [vmem:[#allocation2 + $0x8] sm:$0xf]  ;;  %v1333_v55 = vld [vmem:[#allocation2 + $0x10] sm:$0xf]  ;;  %v1720_v11 = vshrl.u32 %v1704_v6, 16 }
  0xc2   : > { %3237 = vmatprep.subr.bf16.mxu1 %v3472_v16  ;;  %v1334_v56 = vld [vmem:[#allocation2 + $0x18] sm:$0xf]  ;;  %v2887_v57 = vcombine.low %v1332_v54, %v1333_v55  ;;  %v2897_v58 = vcombine.low %v1331_v50, %v1332_v54  ;;  %v1706_v9 = vld [vmem:[#allocation2 + $0x8] sm:$0xf]  ;;  %v1708_v18 = vld [vmem:[#allocation2 + $0x10] sm:$0xf] }
  0xc3   : > { %v2898_v59 = vcombine.low %v1333_v55, %v1334_v56  ;;  %v1734_v13 = vshrl.u32 %v1706_v9, 16  ;;  %v4033_v19 = vld [vmem:[#allocation2 + $0x14] sm:$0x1]  ;;  %v1722_v20 = vrot.slane %v1720_v11, 4  ;;  %v1710_v24 = vld [vmem:[#allocation2 + $0x18] sm:$0xf] }
  0xc4   : > { %3218 = vmatpush3.bf16.msra.mxu0 %v3471_v12  ;;  %3223 = vmatprep.mubr.bf16.mxu0 %v2887_v57  ;;  %v1723_v12 = vshll.u32 %v1704_v6, 16  ;;  %v1748_v26 = vshrl.u32 %v1708_v18, 16  ;;  %v1751_v27 = vshll.u32 %v1708_v18, 16  ;;  %v1762_v31 = vshrl.u32 %v1710_v24, 16  ;;  %v4039_v42 = vld [vmem:[#allocation2 + $0xc] sm:$0x1] }
  0xc5   : > { %3238 = vmatpush3.bf16.msra.mxu1 %v3472_v16  ;;  %3219 = vmatprep.subr.bf16.mxu0 %v3473_v23  ;;  %v4016_v61 = vld [vmem:[#allocation2 + $0x20] sm:$0xf]  ;;  %v1737_v16 = vshll.u32 %v1706_v9, 16  ;;  %v1757_v37 = vshll.u32 %v4033_v19, 16  ;;  %v1743_v46 = vshll.u32 %v4039_v42, 16  ;;  %v3493_v57 = vld [vmem:[%s3910_s13 + $0x188] sm:$0xff]  }
  0xc6   : > { %3239 = vmatprep.subr.bf16.mxu1 %v3474_v32  ;;  %3243 = vmatprep.mubr.bf16.mxu1 %v2897_v58  ;;  %v2888_v63 = vcombine.low %v1334_v56, %v4016_v61  ;;  %v1725_v21 = vrot.slane %v1723_v12, 5  ;;  %v1750_v35 = vrot.slane %v1748_v26, 4  ;;  %v1753_v36 = vrot.slane %v1751_v27, 5  ;;  %v4049_v50 = vld [vmem:[#allocation2 + $0x1c] sm:$0x1]  ;;  %v3497_v9 = vld [vmem:[%s3910_s13 + $0x138] sm:$0xff]  }
  0xc7   : > { %v1739_v25 = vrot.slane %v1737_v16, 5  ;;  %v1764_v40 = vrot.slane %v1762_v31, 4  ;;  %v1759_v51 = vrot.slane %v1757_v37, 5  ;;  %v1745_v54 = vrot.slane %v1743_v46, 5  ;;  %v1328_v6 = vld [vmem:[#allocation2 + $0x24] sm:$0x1] }
  0xc8   : > { %3220 = vmatpush3.bf16.msra.mxu0 %v3473_v23  ;;  %v1736_v23 = vrot.slane %v1734_v13, 4  ;;  %v1726_v30 = vor.u32 %v1725_v21, %v1722_v20  ;;  %v1754_v44 = vor.u32 %v1753_v36, %v1750_v35  ;;  %v1771_v56 = vshll.u32 %v4049_v50, 16  ;;  %v3499_v12 = vld [vmem:[%s3910_s13 + $0x130] sm:$0xff]   ;;  %v3502_v13 = vld [vmem:[%s3910_s13 + $0x1e8] sm:$0xff]   ;;  %v3506_v21 = vld [vmem:[%s3910_s13 + $0x1d8] sm:$0xff]  }
  0xc9   : > { %3240 = vmatpush3.bf16.msra.mxu1 %v3474_v32  ;;  %3221 = vmatprep.subr.bf16.mxu0 %v3475_v38  ;;  %v1765_v32 = vshll.u32 %v1710_v24, 16  ;;  %v1712_v16 = vld [vmem:[#allocation2 + $0x20] sm:$0xf]  ;;  %v3505_v24 = vld [vmem:[%s3910_s13 + $0x118] sm:$0xff]   ;;  %v3510_v36 = vld [vmem:[%s3910_s13 + $0x1c8] sm:$0xff]  }
  0xca   : > { %3241 = vmatprep.subr.bf16.mxu1 %v3476_v45  ;;  %v1740_v34 = vor.u32 %v1739_v25, %v1736_v23  ;;  %v1755_v55 = vrot.slane %v1754_v44, 4  ;;  %v1902_v22 = vshrl.u32 %v1712_v16, 16  ;;  %v1905_v23 = vshll.u32 %v1712_v16, 16  ;;  %v3508_v25 = vld [vmem:[%s3910_s13 + $0x1d0] sm:$0xff]   ;;  %v2175_v46 = vld [vmem:[#allocation2 + $0x10] sm:$0xe] }
  0xcb   : > { %v1767_v41 = vrot.slane %v1765_v32, 5  ;;  %v3507_v35 = vld [vmem:[%s3910_s13 + $0x110] sm:$0xff]   ;;  %v3526_v16 = vld [vmem:[%s3910_s13 + $0x148] sm:$0xff]  }
  0xcc   : > { %3222 = vmatpush3.bf16.msra.mxu0 %v3475_v38  ;;  %v1727_v38 = vrot.slane %v1726_v30, 4  ;;  %v1904_v30 = vrot.slane %v1902_v22, 4  ;;  %v1907_v31 = vrot.slane %v1905_v23, 5  ;;  %v3525_v22 = vld [vmem:[%s3910_s13 + $0x88] sm:$0xff]   ;;  %v3528_v23 = vld [vmem:[%s3910_s13 + $0x140] sm:$0xff]  }
  0xcd   : > { %3242 = vmatpush3.bf16.msra.mxu1 %v3476_v45  ;;  %3247 = vmatprep.subr.bf16.mxu0 %v3481_v52  ;;  %v1741_v45 = vrot.slane %v1740_v34, 4  ;;  %v1768_v48 = vor.u32 %v1767_v41, %v1764_v40  ;;  %v3509_v40 = vld [vmem:[%s3910_s13 + $0x108] sm:$0xff]   ;;  %v3512_v41 = vld [vmem:[%s3910_s13 + $0x1c0] sm:$0xff]  }
  0xce   : > { %3267 = vmatprep.subr.bf16.mxu1 %v3482_v53  ;;  %v1908_v37 = vor.u32 %v1907_v31, %v1904_v30  ;;  %v3529_v31 = vld [vmem:[%s3910_s13 + $0x238] sm:$0xff]  }
  0xcf   : > { %3224 = vmatmul.mubr.bf16.vlgmr.msra.gmra.mxu0 %v2888_v63  ;;  %v1746_v58 = vsel %vm4043_vm13, %v1741_v45, %v1745_v54  ;;  %v3496_v63 = vld [vmem:[%s3910_s13 + $0x40] sm:$0xff]   ;;  %v2173_v54 = vld [vmem:[#allocation2] sm:$0xe] }
  0xd0   : > { %3244 = vmatmul.mubr.bf16.vlgmr.msra.gmra.mxu1 %v2898_v59  ;;  %3248 = vmatpush3.bf16.msra.mxu0 %v3481_v52  ;;  %v3494_v52 = vld [vmem:[%s3910_s13 + $0x48] sm:$0xff]  }
  0xd1   : > { %3268 = vmatpush3.bf16.msra.mxu1 %v3482_v53  ;;  %3249 = vmatprep.subr.bf16.mxu0 %v3483_v62  ;;  %v1732_v53 = vsel %vm4043_vm13, %v1727_v38, %v1731_v39  ;;  %v2200_v39 = vrot.slane %v4033_v19, 5 }
  0xd2   : > { %3269 = vmatprep.subr.bf16.mxu1 %v3484_v60  ;;  %3263 = vmatprep.mubr.bf16.mxu0 %v2898_v59  ;;  %v1769_v59 = vrot.slane %v1768_v48, 4  ;;  %v1909_v48 = vrot.slane %v1908_v37, 4  ;;  %v3535_v37 = vld [vmem:[%s3910_s13 + $0x208] sm:$0xff]  }
  0xd4   : > { %3250 = vmatpush3.bf16.msra.mxu0 %v3483_v62  ;;  %v2948_v62 = vcombine.low %v1732_v53, %v1746_v58 }
  0xd5   : > { %3270 = vmatpush3.bf16.msra.mxu1 %v3484_v60  ;;  %3251 = vmatprep.subr.bf16.mxu0 %v3485_v2  ;;  %v1773_v60 = vrot.slane %v1771_v56, 5  ;;  %v2178_v56 = vld [vmem:[#allocation2 + $0x28] sm:$0xe] }
  0xd6   : > { %3271 = vmatprep.subr.bf16.mxu1 %v3486_v0  ;;  %3283 = vmatprep.mubr.bf16.mxu1 %v2948_v62  ;;  %v3066_v62 = vrot.slane %v2178_v56, 9 }
  0xd7   : > { %v4065_v3 = vsel %vm4043_vm13, %v1769_v59, %v1773_v60  ;;  %v2196_v60 = vrot.slane %v4039_v42, 5  ;;  %v3513_v42 = vld [vmem:[%s3910_s13 + $0xb8] sm:$0xff]  }
  0xd8   : > { %3252 = vmatpush3.bf16.msra.mxu0 %v3485_v2  ;;  %v1760_v2 = vsel %vm4043_vm13, %v1755_v55, %v1759_v51  ;;  %v2174_v51 = vld [vmem:[#allocation2 + $0x8] sm:$0xe] }
  0xd9   : > { %3272 = vmatpush3.bf16.msra.mxu1 %v3486_v0  ;;  %3253 = vmatprep.subr.bf16.mxu0 %v3487_v10  ;;  %v1291_v0 = vrot.slane %v4008_v47, 4  ;;  %v2949_v5 = vcombine.low %v1760_v2, %v4065_v3  ;;  %v1336_v47 = vld [vmem:[#allocation2 + $0x28] sm:$0xf]  ;;  %v2974_v14 = vcombine.low %v1746_v58, %v1760_v2  ;;  %v3010_v59 = vrot.slane %v2174_v51, 9 }
  0xda   : > { %3273 = vmatprep.subr.bf16.mxu1 %v3488_v4  ;;  %v2923_v11 = vcombine.low %v4016_v61, %v1336_v47  ;;  %v3504_v61 = vld [vmem:[%s3910_s13 + $0x1e0] sm:$0xff]   ;;  %v3514_v58 = vld [vmem:[%s3910_s13 + $0x178] sm:$0xff]   ;;  %v3009_v2 = vrot.slane %v2173_v54, 9 }
  0xdb   : > { %v1329_v8 = vsel %vm3990_vm10, %v1291_v0, %v1328_v6  ;;  %v2192_v0 = vrot.slane %v4025_v7, 5  ;;  %v2197_v7 = vsel %vm4094_vm0, %v3010_v59, %v2196_v60 }
  0xdc   : > { %3254 = vmatpush3.bf16.msra.mxu0 %v3487_v10  ;;  %v3500_v10 = vld [vmem:[%s3910_s13 + $0x1f0] sm:$0xff]   ;;  %1330 = vst [vmem:[#allocation2 + $0x24] sm:$0x1] %v1329_v8 }
  0xdd   : > { %3274 = vmatpush3.bf16.msra.mxu1 %v3488_v4  ;;  %3255 = vmatprep.subr.bf16.mxu0 %v3489_v28  ;;  %v3498_v4 = vld [vmem:[%s3910_s13 + $0x1f8] sm:$0xff]   ;;  %v2193_v8 = vsel %vm4094_vm0, %v3009_v2, %v2192_v0 }
  0xde   : > { %3275 = vmatprep.subr.bf16.mxu1 %v3490_v15 }
  0xe0   : > { %3256 = vmatpush3.bf16.msra.mxu0 %v3489_v28  ;;  %v1715_v28 = vld [vmem:[#allocation2 + $0x2c] sm:$0x1] }
  0xe1   : > { %3276 = vmatpush3.bf16.msra.mxu1 %v3490_v15  ;;  %3257 = vmatprep.subr.bf16.mxu0 %v3491_v49  ;;  %v1714_v15 = vld [vmem:[#allocation2 + $0x28] sm:$0xf]  ;;  %v2048_v34 = vshll.u32 %v1715_v28, 16  ;;  %v2465_v53 = vrot.slane %v1715_v28, 5 }
  0xe2   : > { %3277 = vmatprep.subr.bf16.mxu1 %v3492_v33  ;;  %v2039_v18 = vshrl.u32 %v1714_v15, 16  ;;  %v2042_v20 = vshll.u32 %v1714_v15, 16  ;;  %v3524_v15 = vld [vmem:[%s3910_s13 + $0x150] sm:$0xff]  }
  0xe3   : > { %v4082_v32 = vld [vmem:[#allocation2 + $0x24] sm:$0x1]  ;;  %v2050_v45 = vrot.slane %v2048_v34, 5  ;;  %v3532_v34 = vld [vmem:[%s3910_s13 + $0x220] sm:$0xff]  }
  0xe4   : > { %3258 = vmatpush3.bf16.msra.mxu0 %v3491_v49  ;;  %v2041_v26 = vrot.slane %v2039_v18, 4  ;;  %v2044_v27 = vrot.slane %v2042_v20, 5  ;;  %v1911_v38 = vshll.u32 %v4082_v32, 16  ;;  %v2176_v18 = vld [vmem:[#allocation2 + $0x18] sm:$0xe] }
  0xe5   : > { %3278 = vmatpush3.bf16.msra.mxu1 %v3492_v33  ;;  %3259 = vmatprep.subr.bf16.mxu0 %v3493_v57 }
  0xe6   : > { %3279 = vmatprep.subr.bf16.mxu1 %v3494_v52  ;;  %v2045_v33 = vor.u32 %v2044_v27, %v2041_v26  ;;  %v1913_v49 = vrot.slane %v1911_v38, 5  ;;  %v3527_v27 = vld [vmem:[%s3910_s13 + $0x80] sm:$0xff]  }
  0xe7   : > { %v3536_v38 = vld [vmem:[%s3910_s13 + $0x200] sm:$0xff]  }
  0xe8   : > { %3260 = vmatpush3.bf16.msra.mxu0 %v3493_v57  ;;  %v2046_v44 = vrot.slane %v2045_v33, 4  ;;  %v3511_v57 = vld [vmem:[%s3910_s13 + $0x100] sm:$0xff]   ;;  %v3531_v33 = vld [vmem:[%s3910_s13 + $0x228] sm:$0xff]  }
  0xe9   : > { %3280 = vmatpush3.bf16.msra.mxu1 %v3494_v52  ;;  %3261 = vmatprep.subr.bf16.mxu0 %v3495_v1  ;;  %v3011_v52 = vrot.slane %v2175_v46, 9 }
  0xea   : > { %3281 = vmatprep.subr.bf16.mxu1 %v3496_v63  ;;  %v2051_v19 = vsel %vm4043_vm13, %v2046_v44, %v2050_v45 }
  0xec   : > { %3262 = vmatpush3.bf16.msra.mxu0 %v3495_v1 }
  0xed   : > { %3282 = vmatpush3.bf16.msra.mxu1 %v3496_v63  ;;  %3287 = vmatprep.subr.bf16.mxu0 %v3497_v9  ;;  %v1914_v63 = vsel %vm4043_vm13, %v1909_v48, %v1913_v49 }
  0xee   : > { %3307 = vmatprep.subr.bf16.mxu1 %v3498_v4  ;;  %v3000_v1 = vcombine.low %v1914_v63, %v2051_v19  ;;  %v2975_v47 = vcombine.low %v4065_v3, %v1914_v63  ;;  %v3517_v3 = vld [vmem:[%s3910_s13 + $0xa8] sm:$0xff]  }
  0xef   : > { %3264 = vmatmul.mubr.bf16.vlgmr.msra.gmra.mxu0 %v2923_v11  ;;  %v3029_v11 = vcombine.low %v2193_v8, %v2197_v7 }
  0xf0   : > { %3284 = vmatmul.mubr.bf16.vlgmr.msra.gmra.mxu1 %v2949_v5  ;;  %3288 = vmatpush3.bf16.msra.mxu0 %v3497_v9  ;;  %v3515_v9 = vld [vmem:[%s3910_s13 + $0xb0] sm:$0xff]  }
  0xf1   : > { %3308 = vmatpush3.bf16.msra.mxu1 %v3498_v4  ;;  %3323 = vmatprep.mubr.bf16.mxu1 %v2949_v5  ;;  %v4106_v4 = vsel %vm4094_vm0, %v3011_v52, %v2200_v39  ;;  %v4110_v5 = vsel %vm4094_vm0, %v3066_v62, %v2465_v53 }
  0xf2   : > { %3309 = vmatprep.subr.bf16.mxu1 %v3500_v10  ;;  %3289 = vmatprep.subr.bf16.mxu0 %v3499_v12  ;;  %v3056_v6 = vcombine.low %v2197_v7, %v4106_v4 }
  0xf3   : > { %3303 = vmatprep.mubr.bf16.mxu0 %v2974_v14  ;;  %v3522_v14 = vld [vmem:[%s3910_s13 + $0x158] sm:$0xff]  }
  0xf4   : > { %3290 = vmatpush3.bf16.msra.mxu0 %v3499_v12  ;;  %v3520_v12 = vld [vmem:[%s3910_s13 + $0x160] sm:$0xff]  }
  0xf5   : > { %3310 = vmatpush3.bf16.msra.mxu1 %v3500_v10  ;;  %3291 = vmatprep.subr.bf16.mxu0 %v3501_v29  ;;  %v3518_v10 = vld [vmem:[%s3910_s13 + $0x168] sm:$0xff]  }
  0xf6   : > { %3311 = vmatprep.subr.bf16.mxu1 %v3502_v13 }
  0xf8   : > { %3292 = vmatpush3.bf16.msra.mxu0 %v3501_v29  ;;  %v3521_v29 = vld [vmem:[%s3910_s13 + $0x98] sm:$0xff]  }
  0xf9   : > { %3312 = vmatpush3.bf16.msra.mxu1 %v3502_v13  ;;  %3293 = vmatprep.subr.bf16.mxu0 %v3503_v17  ;;  %v3519_v13 = vld [vmem:[%s3910_s13 + $0xa0] sm:$0xff]  }
  0xfa   : > { %3313 = vmatprep.subr.bf16.mxu1 %v3504_v61 }
  0xfc   : > { %3294 = vmatpush3.bf16.msra.mxu0 %v3503_v17  ;;  %v2177_v17 = vld [vmem:[#allocation2 + $0x20] sm:$0xe] }
  0xfd   : > { %3314 = vmatpush3.bf16.msra.mxu1 %v3504_v61  ;;  %3295 = vmatprep.subr.bf16.mxu0 %v3505_v24  ;;  %v3523_v61 = vld [vmem:[%s3910_s13 + $0x90] sm:$0xff]   ;;  %v3039_v20 = vrot.slane %v2177_v17, 9 }
  0xfe   : > { %3315 = vmatprep.subr.bf16.mxu1 %v3506_v21 }
 0x100   : > { %3296 = vmatpush3.bf16.msra.mxu0 %v3505_v24  ;;  %v3012_v24 = vrot.slane %v2176_v18, 9 }
 0x101   : > { %3316 = vmatpush3.bf16.msra.mxu1 %v3506_v21  ;;  %3297 = vmatprep.subr.bf16.mxu0 %v3507_v35  ;;  %v2336_v21 = vrot.slane %v4082_v32, 5  ;;  %v3530_v32 = vld [vmem:[%s3910_s13 + $0x230] sm:$0xff]  }
 0x102   : > { %3317 = vmatprep.subr.bf16.mxu1 %v3508_v25 }
 0x103   : > { %v2337_v26 = vsel %vm4094_vm0, %v3039_v20, %v2336_v21 }
 0x104   : > { %3298 = vmatpush3.bf16.msra.mxu0 %v3507_v35  ;;  %v3533_v35 = vld [vmem:[%s3910_s13 + $0x218] sm:$0xff]   ;;  %v3083_v39 = vcombine.low %v2337_v26, %v4110_v5 }
 0x105   : > { %3318 = vmatpush3.bf16.msra.mxu1 %v3508_v25  ;;  %3299 = vmatprep.subr.bf16.mxu0 %v3509_v40  ;;  %v2204_v25 = vrot.slane %v4049_v50, 5 }
 0x106   : > { %3319 = vmatprep.subr.bf16.mxu1 %v3510_v36 }
 0x107   : > { %v2205_v28 = vsel %vm4094_vm0, %v3012_v24, %v2204_v25 }
 0x108   : > { %3300 = vmatpush3.bf16.msra.mxu0 %v3509_v40  ;;  %v3057_v30 = vcombine.low %v2205_v28, %v2337_v26  ;;  %v3030_v50 = vcombine.low %v4106_v4, %v2205_v28 }
 0x109   : > { %3320 = vmatpush3.bf16.msra.mxu1 %v3510_v36  ;;  %3301 = vmatprep.subr.bf16.mxu0 %v3511_v57  ;;  %v3534_v36 = vld [vmem:[%s3910_s13 + $0x210] sm:$0xff]  }
 0x10a   : > { %3321 = vmatprep.subr.bf16.mxu1 %v3512_v41 }
 0x10c   : > { %3302 = vmatpush3.bf16.msra.mxu0 %v3511_v57 }
 0x10d   : > { %3322 = vmatpush3.bf16.msra.mxu1 %v3512_v41  ;;  %3327 = vmatprep.subr.bf16.mxu0 %v3513_v42 }
 0x10e   : > { %3347 = vmatprep.subr.bf16.mxu1 %v3514_v58 }
 0x10f   : > { %3304 = vmatmul.mubr.bf16.vlgmr.msra.gmra.mxu0 %v2975_v47 }
 0x110   : > { %3324 = vmatmul.mubr.bf16.vlgmr.msra.gmra.mxu1 %v3000_v1  ;;  %3328 = vmatpush3.bf16.msra.mxu0 %v3513_v42 }
 0x111   : > { %3348 = vmatpush3.bf16.msra.mxu1 %v3514_v58  ;;  %3363 = vmatprep.mubr.bf16.mxu1 %v3056_v6 }
 0x112   : > { %3349 = vmatprep.subr.bf16.mxu1 %v3516_v43  ;;  %3329 = vmatprep.subr.bf16.mxu0 %v3515_v9 }
 0x113   : > { %3343 = vmatprep.mubr.bf16.mxu0 %v3029_v11 }
 0x114   : > { %3330 = vmatpush3.bf16.msra.mxu0 %v3515_v9 }
 0x115   : > { %3350 = vmatpush3.bf16.msra.mxu1 %v3516_v43  ;;  %3331 = vmatprep.subr.bf16.mxu0 %v3517_v3 }
 0x116   : > { %3351 = vmatprep.subr.bf16.mxu1 %v3518_v10 }
 0x118   : > { %3332 = vmatpush3.bf16.msra.mxu0 %v3517_v3 }
 0x119   : > { %3352 = vmatpush3.bf16.msra.mxu1 %v3518_v10  ;;  %3333 = vmatprep.subr.bf16.mxu0 %v3519_v13 }
 0x11a   : > { %3353 = vmatprep.subr.bf16.mxu1 %v3520_v12 }
 0x11c   : > { %3334 = vmatpush3.bf16.msra.mxu0 %v3519_v13 }
 0x11d   : > { %3354 = vmatpush3.bf16.msra.mxu1 %v3520_v12  ;;  %3335 = vmatprep.subr.bf16.mxu0 %v3521_v29 }
 0x11e   : > { %3355 = vmatprep.subr.bf16.mxu1 %v3522_v14 }
 0x120   : > { %3336 = vmatpush3.bf16.msra.mxu0 %v3521_v29 }
 0x121   : > { %3356 = vmatpush3.bf16.msra.mxu1 %v3522_v14  ;;  %3337 = vmatprep.subr.bf16.mxu0 %v3523_v61 }
 0x122   : > { %3357 = vmatprep.subr.bf16.mxu1 %v3524_v15 }
 0x124   : > { %3338 = vmatpush3.bf16.msra.mxu0 %v3523_v61 }
 0x125   : > { %3358 = vmatpush3.bf16.msra.mxu1 %v3524_v15  ;;  %3339 = vmatprep.subr.bf16.mxu0 %v3525_v22 }
 0x126   : > { %3359 = vmatprep.subr.bf16.mxu1 %v3526_v16 }
 0x128   : > { %3340 = vmatpush3.bf16.msra.mxu0 %v3525_v22 }
 0x129   : > { %3360 = vmatpush3.bf16.msra.mxu1 %v3526_v16  ;;  %3341 = vmatprep.subr.bf16.mxu0 %v3527_v27 }
 0x12a   : > { %3361 = vmatprep.subr.bf16.mxu1 %v3528_v23 }
 0x12c   : > { %3342 = vmatpush3.bf16.msra.mxu0 %v3527_v27 }
 0x12d   : > { %3362 = vmatpush3.bf16.msra.mxu1 %v3528_v23  ;;  %3367 = vmatprep.subr.bf16.mxu0 %v3529_v31 }
 0x12f   : > { %3344 = vmatmul.mubr.bf16.vlgmr.msra.gmra.mxu0 %v3030_v50 }
 0x130   : > { %3364 = vmatmul.mubr.bf16.vlgmr.msra.gmra.mxu1 %v3057_v30  ;;  %3368 = vmatpush3.bf16.msra.mxu0 %v3529_v31 }
 0x131   : > { %3383 = vmatprep.mubr.bf16.mxu0 %v3030_v50  ;;  %3369 = vmatprep.subr.bf16.mxu0 %v3530_v32 }
 0x134   : > { %3370 = vmatpush3.bf16.msra.mxu0 %v3530_v32 }
 0x135   : > { %3371 = vmatprep.subr.bf16.mxu0 %v3531_v33 }
 0x138   : > { %3372 = vmatpush3.bf16.msra.mxu0 %v3531_v33 }
 0x139   : > { %3373 = vmatprep.subr.bf16.mxu0 %v3532_v34 }
 0x13c   : > { %3374 = vmatpush3.bf16.msra.mxu0 %v3532_v34 }
 0x13d   : > { %3375 = vmatprep.subr.bf16.mxu0 %v3533_v35 }
 0x140   : > { %3376 = vmatpush3.bf16.msra.mxu0 %v3533_v35 }
 0x141   : > { %3377 = vmatprep.subr.bf16.mxu0 %v3534_v36 }
 0x144   : > { %3378 = vmatpush3.bf16.msra.mxu0 %v3534_v36 }
 0x145   : > { %3379 = vmatprep.subr.bf16.mxu0 %v3535_v37 }
 0x148   : > { %3380 = vmatpush3.bf16.msra.mxu0 %v3535_v37 }
 0x149   : > { %3381 = vmatprep.subr.bf16.mxu0 %v3536_v38 }
 0x14c   : > { %3382 = vmatpush3.bf16.msra.mxu0 %v3536_v38 }
 0x14f   : > { %3384 = vmatmul.mubr.bf16.vlgmr.msra.gmra.mxu0 %v3083_v39 }
 0x18f   : > { %v3225_v40 = vpop.f32.mrf.mxu0 }
 0x190   : > { %v3245_v41 = vpop.f32.mrf.mxu1 }
 0x191   : > { %v1464_v44 = vpop.f32.mrf.mxu0  ;;  %v1576_v1 = vadd.f32 %v3245_v41, %v3225_v40 }
 0x192   : > { %v1567_v45 = vpop.f32.mrf.mxu1 }
 0x193   : > { %v3226_v46 = vpop.f32.mrf.mxu0  ;;  %v1568_v2 = vadd.f32 %v1567_v45, %v1464_v44 }
 0x194   : > { %v3246_v48 = vpop.f32.mrf.mxu1 }
 0x195   : > { %v1467_v49 = vpop.f32.mrf.mxu0  ;;  %v1579_v43 = vadd.f32 %v3246_v48, %v3226_v46 }
 0x196   : > { %v1570_v52 = vpop.f32.mrf.mxu1 }
 0x197   : > { %v1571_v47 = vadd.f32 %v1570_v52, %v1467_v49 }
 0x1af   : > { %v3265_v51 = vpop.f32.mrf.mxu0 }
 0x1b0   : > { %v3285_v19 = vpop.f32.mrf.mxu1  ;;  %v1702_v4 = vadd.f32 %v3265_v51, %v1576_v1 }
 0x1b1   : > { %v1685_v53 = vpop.f32.mrf.mxu0 }
 0x1b2   : > { %v1882_v55 = vpop.f32.mrf.mxu1  ;;  %v1700_v7 = vadd.f32 %v1685_v53, %v1568_v2  ;;  %v1899_v8 = vadd.f32 %v3285_v19, %v1702_v4 }
 0x1b3   : > { %v3266_v54 = vpop.f32.mrf.mxu0 }
 0x1b4   : > { %v3286_v57 = vpop.f32.mrf.mxu1  ;;  %v1703_v9 = vadd.f32 %v3266_v54, %v1579_v43  ;;  %v1897_v11 = vadd.f32 %v1882_v55, %v1700_v7 }
 0x1b5   : > { %v1688_v56 = vpop.f32.mrf.mxu0 }
 0x1b6   : > { %v1885_v59 = vpop.f32.mrf.mxu1  ;;  %v1701_v3 = vadd.f32 %v1688_v56, %v1571_v47  ;;  %v1900_v29 = vadd.f32 %v3286_v57, %v1703_v9 }
 0x1b8   : > { %v1898_v61 = vadd.f32 %v1885_v59, %v1701_v3 }
 0x1cf   : > { %v3305_v58 = vpop.f32.mrf.mxu0 }
 0x1d0   : > { %v3325_v62 = vpop.f32.mrf.mxu1  ;;  %v2036_v12 = vadd.f32 %v3305_v58, %v1899_v8 }
 0x1d1   : > { %v2019_v60 = vpop.f32.mrf.mxu0 }
 0x1d2   : > { %v2154_v0 = vpop.f32.mrf.mxu1  ;;  %v2034_v15 = vadd.f32 %v2019_v60, %v1897_v11  ;;  %v2171_v16 = vadd.f32 %v3325_v62, %v2036_v12 }
 0x1d3   : > { %v3306_v63 = vpop.f32.mrf.mxu0 }
 0x1d4   : > { %v3326_v42 = vpop.f32.mrf.mxu1  ;;  %v2037_v17 = vadd.f32 %v3306_v63, %v1900_v29  ;;  %v2169_v21 = vadd.f32 %v2154_v0, %v2034_v15 }
 0x1d5   : > { %v2022_v5 = vpop.f32.mrf.mxu0 }
 0x1d6   : > { %v2157_v10 = vpop.f32.mrf.mxu1  ;;  %v2035_v22 = vadd.f32 %v2022_v5, %v1898_v61  ;;  %v2172_v24 = vadd.f32 %v3326_v42, %v2037_v17 }
 0x1d8   : > { %v2170_v28 = vadd.f32 %v2157_v10, %v2035_v22 }
 0x1ef   : > { %v3345_v6 = vpop.f32.mrf.mxu0 }
 0x1f0   : > { %v3365_v14 = vpop.f32.mrf.mxu1  ;;  %v2330_v23 = vadd.f32 %v3345_v6, %v2171_v16 }
 0x1f1   : > { %v2313_v13 = vpop.f32.mrf.mxu0 }
 0x1f2   : > { %v2442_v20 = vpop.f32.mrf.mxu1  ;;  %v2328_v25 = vadd.f32 %v2313_v13, %v2169_v21  ;;  %v2459_v30 = vadd.f32 %v3365_v14, %v2330_v23 }
 0x1f3   : > { %v3346_v18 = vpop.f32.mrf.mxu0 }
 0x1f4   : > { %v3366_v27 = vpop.f32.mrf.mxu1  ;;  %v2331_v31 = vadd.f32 %v3346_v18, %v2172_v24  ;;  %v2457_v32 = vadd.f32 %v2442_v20, %v2328_v25 }
 0x1f5   : > { %v2316_v26 = vpop.f32.mrf.mxu0 }
 0x1f6   : > { %v2329_v33 = vadd.f32 %v2316_v26, %v2170_v28  ;;  %v2445_v35 = vpop.f32.mrf.mxu1  ;;  %v2460_v37 = vadd.f32 %v3366_v27, %v2331_v31 }
 0x1f8   : > { %v2458_v40 = vadd.f32 %v2445_v35, %v2329_v33 }
 0x20f   : > { %v3385_v50 = vpop.f32.mrf.mxu0 }
 0x210   : > { %v2586_v34 = vadd.f32 %v3385_v50, %v2459_v30 }
 0x211   : > { %v2569_v36 = vpop.f32.mrf.mxu0 }
 0x212   : > { %v2584_v38 = vadd.f32 %v2569_v36, %v2457_v32  ;;  %2590 = sbr.rel (%p2866_p4) target bundleno = 538 (0x21a), region = 150 }
 0x213   : > { %v3386_v39 = vpop.f32.mrf.mxu0 }
 0x214   : > { %v2587_v41 = vadd.f32 %v3386_v39, %v2460_v37 }
 0x215   : > { %v2572_v44 = vpop.f32.mrf.mxu0 }
 0x216   : > { %v2585_v45 = vadd.f32 %v2572_v44, %v2458_v40 }
 0x217   : > { %vm2591_vm1 = vcmask 523264  }
 0x218   : > { %2592 = vst.msk [vmem:[#allocation3] sm:$0xff] %vm2591_vm1, %v2584_v38  ;;  %2593 = vst.msk [vmem:[#allocation3 + $0x8] sm:$0xff] %vm2591_vm1, %v2585_v45 }
 0x219   : > { %2594 = vst.msk [vmem:[#allocation3 + $0x10] sm:$0xff] %vm2591_vm1, %v2586_v34  ;;  %2595 = vst.msk [vmem:[#allocation3 + $0x18] sm:$0xff] %vm2591_vm1, %v2587_v41 }
 0x21a PF: > { %p3093_p9 = scmp.le.s32.totalorder %s3591_s25, 0 }
 0x21c   : > { %2599 = sbr.rel (%p3093_p9) target bundleno = 550 (0x226), region = 154 }
 0x221   : > { %v2600_v46 = vld [vmem:[#allocation3] sm:$0xff]  ;;  %vm2608_vm2 = vcmask 523264   ;;  %v2601_v48 = vld [vmem:[#allocation3 + $0x8] sm:$0xff]  ;;  %v2602_v49 = vld [vmem:[#allocation3 + $0x10] sm:$0xff] }
 0x222   : > { %v2604_v51 = vadd.f32 %v2600_v46, %v2584_v38  ;;  %v2605_v52 = vadd.f32 %v2601_v48, %v2585_v45  ;;  %v2606_v53 = vadd.f32 %v2602_v49, %v2586_v34  ;;  %v2603_v19 = vld [vmem:[#allocation3 + $0x18] sm:$0xff] }
 0x223   : > { %v2607_v54 = vadd.f32 %v2603_v19, %v2587_v41 }
 0x224   : > { %2609 = vst.msk [vmem:[#allocation3] sm:$0xff] %vm2608_vm2, %v2604_v51  ;;  %2610 = vst.msk [vmem:[#allocation3 + $0x8] sm:$0xff] %vm2608_vm2, %v2605_v52 }
 0x225   : > { %2611 = vst.msk [vmem:[#allocation3 + $0x10] sm:$0xff] %vm2608_vm2, %v2606_v53  ;;  %2612 = vst.msk [vmem:[#allocation3 + $0x18] sm:$0xff] %vm2608_vm2, %v2607_v54 }
 0x226 PF: > { %p3094_p10 = scmp.ne.s32.totalorder %s3591_s25, 1 }
 0x228   : > { %2616 = sbr.rel (%p3094_p10) target bundleno = 569 (0x239), region = 158 }
 0x22d   : > { %v2617_v55 = vld [vmem:[#allocation3] sm:$0xff]  ;;  %v3095_v56 = vld [vmem:[%s4194_s4] ss:$0 sm:$0xff]  ;;  %v2618_v59 = vld [vmem:[#allocation3 + $0x8] sm:$0xff]  ;;  %vm2663_vm3 = vcmask 519168  }
 0x22e   : > { %v3096_v57 = vld [vmem:[%s4195_s5] ss:$0 sm:$0xff]  ;;  %v2628_v58 = vmul.f32 %v3095_v56, %v2617_v55  ;;  %v2620_v62 = vld [vmem:[#allocation3 + $0x18] sm:$0xff]  ;;  %v2629_v63 = vmul.f32 %v3095_v56, %v2618_v59 }
 0x22f   : > { %v2619_v60 = vld [vmem:[#allocation3 + $0x10] sm:$0xff]  ;;  %v2631_v1 = vmul.f32 %v3095_v56, %v2620_v62 }
 0x230   : > { %v2630_v0 = vmul.f32 %v3095_v56, %v2619_v60  ;;  %v2639_v2 = vadd.f32 %v3096_v57, %v2628_v58  ;;  %v2640_v4 = vadd.f32 %v3096_v57, %v2629_v63 }
 0x231   : > { %v2642_v42 = vadd.f32 %v3096_v57, %v2631_v1 }
 0x232   : > { %v2641_v5 = vadd.f32 %v3096_v57, %v2630_v0  ;;  %v2643_v43 = vmax.f32 %v2639_v2, 0.0  ;;  %v2644_v7 = vmax.f32 %v2640_v4, 0.0 }
 0x233   : > { %v2646_v47 = vmax.f32 %v2642_v42, 0.0 }
 0x234   : > { %v2645_v6 = vmax.f32 %v2641_v5, 0.0  ;;  %v3113_v8 = vpack.c.bf16 %v2643_v43, %v2643_v43  ;;  %v3114_v9 = vpack.c.bf16 %v2644_v7, %v2644_v7 }
 0x235   : > { %v3116_v11 = vpack.c.bf16 %v2646_v47, %v2646_v47 }
 0x236   : > { %v3115_v10 = vpack.c.bf16 %v2645_v6, %v2645_v6  ;;  %2664 = vst.msk [vmem:[%s3900_s30] sm:$0xf] %vm2663_vm3, %v3113_v8  ;;  %2665 = vst.msk [vmem:[%s3900_s30 + $0x4] sm:$0xf] %vm2663_vm3, %v3114_v9 }
 0x237   : > { %2667 = vst.msk [vmem:[%s3900_s30 + $0xc] sm:$0xf] %vm2663_vm3, %v3116_v11 }
 0x238   : > { %2666 = vst.msk [vmem:[%s3900_s30 + $0x8] sm:$0xf] %vm2663_vm3, %v3115_v10 }
 0x239 PF: > { %s16_s29 = sadd.s32 1, %s3607_s29   ;;  %s4221_s26 = sld [smem:[#allocation6_spill]] }
 0x23a   : > { %p13_p11 = scmp.ge.s32.totalorder %s16_s29, 10   ;;  %s4222_s15 = sld [smem:[#allocation7_spill]] }
 0x23b   : > { %s4223_s28 = sld [smem:[#allocation8_spill]]  ;;  %s4224_s21 = smov %s3579_s22 }
 0x23c   : > { %s4225_s22 = smov %s3709_s11  ;;  %s4226_s23 = smov %s3587_s24 }
 0x23d   : > { %s4227_s24 = smov %s3719_s16  ;;  %s4228_s25 = smov %s3599_s27 }
 0x23e   :  { %15 = sbr.rel (!%p13_p11) target bundleno = 8 (0x8), region = 218 }
 0x240   : > { %s4229_s27 = smov %s4222_s15 }

</bundles_post_ra>
